<compile_context>
chip_gen: v6e
topology: v6e:2x2x1
jax: 0.10.0
libtpu: 0.0.40
codegen_flags: <defaults>
</compile_context>

<pallas_src>
import functools

import jax
import jax.numpy as jnp
from jax.experimental import pallas as pl
from jax.experimental.pallas import tpu as pltpu


_VMEM = pl.BlockSpec(memory_space=pltpu.MemorySpace.VMEM)
_BN_EPS = 1e-5
_NORM_EPS = 1e-6
_MATMUL_DTYPE = jnp.bfloat16   # MXU operand dtype (f32 accumulation everywhere)


# ----------------------------------------------------------------------------
# Fused kernel
# ----------------------------------------------------------------------------
def _bn_apply(y, g, b, relu):
    """Training-mode BatchNorm1d over the lane axis (B*T): one-pass stats,
    biased variance, eps=1e-5, applied as y*scale + shift."""
    inv_n = 1.0 / y.shape[1]
    s1 = jnp.sum(y, axis=1, keepdims=True)
    s2 = jnp.sum(y * y, axis=1, keepdims=True)
    mu = s1 * inv_n
    var = s2 * inv_n - mu * mu
    scale = g * jax.lax.rsqrt(var + _BN_EPS)
    shift = b - mu * scale
    y = y * scale + shift
    return jnp.maximum(y, 0.0) if relu else y


def make_fused_kernel(metas, n_params, n_enc_blocks, B, T):
    """metas: tuple of (cin, cout, has_linear_shortcut) per ConvBlock."""
    BL = B * T

    def kernel(*refs):
        x_ref = refs[0]                       # (B, F, T) f32
        prefs = refs[1:1 + n_params]          # flat per-block params
        out_ref = refs[1 + n_params]          # (B, Cout_final, T)
        latent_ref = refs[2 + n_params]       # (B, C_latent, T)
        xs_ref = refs[3 + n_params]           # (3*Cmax, B*T) f32 scratch

        F = x_ref.shape[1]
        n = F * T

        # ---- norm_spectogram (per batch, unbiased var, eps=1e-6) fused with
        #      the (B,F,T) -> (F, B*T) relayout (batch segments along lanes).
        cols = []
        for b in range(B):
            xb = x_ref[b]                                              # (F, T)
            s = jnp.sum(jnp.sum(xb, axis=1, keepdims=True), axis=0, keepdims=True)
            mu = s * (1.0 / n)
            d = xb - mu
            ss = jnp.sum(jnp.sum(d * d, axis=1, keepdims=True), axis=0,
                         keepdims=True)
            var = ss * (1.0 / (n - 1))                                 # unbiased
            cols.append(d * jax.lax.rsqrt(var + _NORM_EPS))
        x = jnp.concatenate(cols, axis=1)                              # (F, B*T)

        # ---- segment-boundary lane masks, computed ONCE and reused ----
        pos = jax.lax.broadcasted_iota(jnp.int32, (1, BL), 1) % T      # T pow2
        not_first = pos != 0
        not_last = pos != (T - 1)

        def stack_taps(v, c):
            """Store [v_{t-1}; v_t; v_{t+1}] into scratch, return (3c, BL)."""
            vl = jnp.where(not_first, pltpu.roll(v, shift=1, axis=1), 0.0)
            vr = jnp.where(not_last, pltpu.roll(v, shift=BL - 1, axis=1), 0.0)
            xs_ref[0:c, :] = vl
            xs_ref[c:2 * c, :] = v
            xs_ref[2 * c:3 * c, :] = vr
            return xs_ref[0:3 * c, :]

        idx = 0
        for bi, (cin, cout, linear) in enumerate(metas):
            if linear:
                w1aug, g1, b1, bsc, w2s, g2, b2 = prefs[idx:idx + 7]
                idx += 7
            else:
                w1aug, g1, b1, w2s, g2, b2 = prefs[idx:idx + 6]
                idx += 6
            wdt = w1aug.dtype

            # conv1 (+ folded Linear shortcut rows) -> ONE stacked MXU matmul
            xs = stack_taps(x, cin).astype(wdt)                        # (3cin, BL)
            r = jnp.dot(w1aug[...], xs, preferred_element_type=jnp.float32)
            y = r[0:cin, :]
            sc = (r[cin:cin + cout, :] + bsc[...]) if linear else x

            y = _bn_apply(y, g1[...], b1[...], relu=True)              # BN + ReLU

            # conv2 -> ONE stacked MXU matmul
            ys = stack_taps(y, cin).astype(wdt)
            z = jnp.dot(w2s[...], ys, preferred_element_type=jnp.float32)
            z = _bn_apply(z, g2[...], b2[...], relu=False)             # BN only

            x = z + sc                                                 # residual

            if bi == n_enc_blocks - 1:                                 # latent
                for b in range(B):
                    latent_ref[b] = x[:, b * T:(b + 1) * T]

        for b in range(B):
            out_ref[b] = x[:, b * T:(b + 1) * T]

    return kernel


def fused_ae_apply(input_specs, flat_params, metas, n_enc_blocks):
    """input_specs: (B, F, T) f32. Returns (output_specs, latent)."""
    B, F, T = input_specs.shape
    assert T & (T - 1) == 0, "T must be a power of two (mask mod -> AND)"
    for cin, _, _ in metas:
        assert cin % 8 == 0, "channel counts must be multiples of 8 (sublane slices)"
    cmax = max(m[0] for m in metas)
    clat = metas[n_enc_blocks - 1][1]
    cfin = metas[-1][1]

    kernel = make_fused_kernel(metas, len(flat_params), n_enc_blocks, B, T)
    return pl.pallas_call(
        kernel,
        out_shape=(jax.ShapeDtypeStruct((B, cfin, T), jnp.float32),
                   jax.ShapeDtypeStruct((B, clat, T), jnp.float32)),
        in_specs=[_VMEM] * (1 + len(flat_params)),
        out_specs=(_VMEM, _VMEM),
        scratch_shapes=[pltpu.VMEM((3 * cmax, B * T), jnp.float32)],
    )(input_specs, *flat_params)


# ----------------------------------------------------------------------------
# Parameter construction (deterministic, synthetic) + stacking for the kernel
# ----------------------------------------------------------------------------
def init_conv_block(key, cin, cout):
    k1, k2, k3, k4 = jax.random.split(key, 4)
    p = {
        # conv weights stored as (3 taps, C_out, C_in); tap0 pairs with x_{t-1}
        "w1": jax.random.normal(k1, (3, cin, cin), jnp.float32) * 0.15,
        "w2": jax.random.normal(k2, (3, cout, cin), jnp.float32) * 0.15,
        # BatchNorm affine params (PyTorch init: gamma=1, beta=0), shaped (C,1)
        "g1": jnp.ones((cin, 1), jnp.float32),
        "b1": jnp.zeros((cin, 1), jnp.float32),
        "g2": jnp.ones((cout, 1), jnp.float32),
        "b2": jnp.zeros((cout, 1), jnp.float32),
        "linear_shortcut": cin != cout,
    }
    if cin != cout:   # nn.Linear shortcut
        p["wsc"] = jax.random.normal(k3, (cout, cin), jnp.float32) * 0.15
        p["bsc"] = jax.random.normal(k4, (cout, 1), jnp.float32) * 0.05
    return p


def init_conv_cnn(key, in_channels, reduction_ratios, target_out_channels=None):
    blocks = []
    c = in_channels
    for i, r in enumerate(reduction_ratios):
        if i == len(reduction_ratios) - 1 and target_out_channels is not None:
            cout = target_out_channels
        else:
            cout = int(c * r)
        key, sub = jax.random.split(key)
        blocks.append(init_conv_block(sub, c, cout))
        c = int(c * r)
    return blocks, c


def prepare_block_params(raw, compute_dtype=_MATMUL_DTYPE):
    """Stack conv taps (and fold the Linear shortcut into conv1) for the kernel."""
    cin = raw["w1"].shape[1]
    cout = raw["w2"].shape[1]
    w1s = jnp.concatenate([raw["w1"][0], raw["w1"][1], raw["w1"][2]], axis=1)
    w2s = jnp.concatenate([raw["w2"][0], raw["w2"][1], raw["w2"][2]], axis=1)
    linear = raw["linear_shortcut"]
    if linear:
        z = jnp.zeros((cout, cin), jnp.float32)
        sc_rows = jnp.concatenate([z, raw["wsc"], z], axis=1)       # center tap
        w1aug = jnp.concatenate([w1s, sc_rows], axis=0)             # (cin+cout,3cin)
        flat = [w1aug.astype(compute_dtype), raw["g1"], raw["b1"], raw["bsc"],
                w2s.astype(compute_dtype), raw["g2"], raw["b2"]]
    else:
        flat = [w1s.astype(compute_dtype), raw["g1"], raw["b1"],
                w2s.astype(compute_dtype), raw["g2"], raw["b2"]]
    return (cin, cout, bool(linear)), flat


def prepare_all(raw_blocks):
    metas, flat = [], []
    for raw in raw_blocks:
        m, f = prepare_block_params(raw)
        metas.append(m)
        flat.extend(f)
    return tuple(metas), flat


# ----------------------------------------------------------------------------
# Spectrogram transform (plain-JAX glue; stands in for SpectogramTransform)
# ----------------------------------------------------------------------------
def spectrogram_transform(waveforms, n_fft, hop_length):
    """waveforms: (B, 1, T). Returns magnitude and phases, each (B, F, frames)."""
    b, _, t = waveforms.shape
    n_frames = 1 + (t - n_fft) // hop_length
    idx = jnp.arange(n_frames)[:, None] * hop_length + jnp.arange(n_fft)[None, :]
    frames = waveforms[:, 0, :][:, idx]                           # (B, frames, n_fft)
    window = jnp.hanning(n_fft).astype(jnp.float32)
    spec = jnp.fft.rfft(frames * window, axis=-1)                 # (B, frames, F)
    mag = jnp.abs(spec).astype(jnp.float32).transpose(0, 2, 1)    # (B, F, frames)
    phase = jnp.angle(spec).astype(jnp.float32).transpose(0, 2, 1)
    return mag, phase


# ----------------------------------------------------------------------------
# Full forward (encoder + decoder), mirrors SingleChannelAE_CNN.forward
# ----------------------------------------------------------------------------
def single_channel_ae_cnn_forward(waveforms, flat_params, *, metas,
                                  n_enc_blocks, n_fft, hop):
    input_specs, phases = spectrogram_transform(waveforms, n_fft, hop)
    out_specs, latent = fused_ae_apply(input_specs, flat_params, metas,
                                       n_enc_blocks)
    # TODO(synk): spectral_loss / temporal_loss / InverseSpectogramTransform are
    # undefined external deps in the reference module; loss computation omitted.
    return {
        "output_specs": out_specs,
        "latent": latent,
        "input_specs": input_specs,
        "phases": phases,
        "input_waveforms": waveforms,
    }


# ----------------------------------------------------------------------------
if __name__ == "__main__":
    # Config: n_fft=62 -> n_channels = 62//2 + 1 = 32, reduction_ratios=[0.5,0.5],
    # shortcut=True, n_conv=2, batch_norm=True, predict_phases=False.
    n_fft, hop = 62, 32
    reduction_ratios = [0.5, 0.5]
    n_channels = n_fft // 2 + 1                      # 32

    batch = 2
    n_frames = 128
    t_wav = n_fft + (n_frames - 1) * hop             # 4126

    key = jax.random.PRNGKey(0)
    k_wave, k_enc, k_dec = jax.random.split(key, 3)

    input_waveforms = jax.random.normal(k_wave, (batch, 1, t_wav), jnp.float32)

    enc_blocks, enc_out = init_conv_cnn(k_enc, n_channels, reduction_ratios)    # 32->16->8
    dec_blocks, _ = init_conv_cnn(
        k_dec, enc_out, [1.0 / r for r in reduction_ratios[::-1]],
        target_out_channels=n_channels)                                         # 8->16->32

    metas, flat_params = prepare_all(enc_blocks + dec_blocks)

    fwd = jax.jit(functools.partial(single_channel_ae_cnn_forward,
                                    metas=metas, n_enc_blocks=len(enc_blocks),
                                    n_fft=n_fft, hop=hop))
    out = fwd(input_waveforms, flat_params)
    jax.block_until_ready(out)

    assert out["output_specs"].shape == (batch, n_channels, n_frames)
    assert out["latent"].shape == (batch, 8, n_frames)
    assert bool(jnp.all(jnp.isfinite(out["output_specs"])))
    assert bool(jnp.all(jnp.isfinite(out["latent"])))
    print("KERNEL_OK")
</pallas_src>

<mosaic_0001>
module attributes {stable_mosaic.version = 11 : i64} {
  func.func @kernel(%arg0: memref<2x32x128xf32, #tpu.memory_space<vmem>>, %arg1: memref<48x96xbf16, #tpu.memory_space<vmem>>, %arg2: memref<32x1xf32, #tpu.memory_space<vmem>>, %arg3: memref<32x1xf32, #tpu.memory_space<vmem>>, %arg4: memref<16x1xf32, #tpu.memory_space<vmem>>, %arg5: memref<16x96xbf16, #tpu.memory_space<vmem>>, %arg6: memref<16x1xf32, #tpu.memory_space<vmem>>, %arg7: memref<16x1xf32, #tpu.memory_space<vmem>>, %arg8: memref<24x48xbf16, #tpu.memory_space<vmem>>, %arg9: memref<16x1xf32, #tpu.memory_space<vmem>>, %arg10: memref<16x1xf32, #tpu.memory_space<vmem>>, %arg11: memref<8x1xf32, #tpu.memory_space<vmem>>, %arg12: memref<8x48xbf16, #tpu.memory_space<vmem>>, %arg13: memref<8x1xf32, #tpu.memory_space<vmem>>, %arg14: memref<8x1xf32, #tpu.memory_space<vmem>>, %arg15: memref<24x24xbf16, #tpu.memory_space<vmem>>, %arg16: memref<8x1xf32, #tpu.memory_space<vmem>>, %arg17: memref<8x1xf32, #tpu.memory_space<vmem>>, %arg18: memref<16x1xf32, #tpu.memory_space<vmem>>, %arg19: memref<16x24xbf16, #tpu.memory_space<vmem>>, %arg20: memref<16x1xf32, #tpu.memory_space<vmem>>, %arg21: memref<16x1xf32, #tpu.memory_space<vmem>>, %arg22: memref<48x48xbf16, #tpu.memory_space<vmem>>, %arg23: memref<16x1xf32, #tpu.memory_space<vmem>>, %arg24: memref<16x1xf32, #tpu.memory_space<vmem>>, %arg25: memref<32x1xf32, #tpu.memory_space<vmem>>, %arg26: memref<32x48xbf16, #tpu.memory_space<vmem>>, %arg27: memref<32x1xf32, #tpu.memory_space<vmem>>, %arg28: memref<32x1xf32, #tpu.memory_space<vmem>>, %arg29: memref<2x32x128xf32, #tpu.memory_space<vmem>>, %arg30: memref<2x8x128xf32, #tpu.memory_space<vmem>>, %arg31: memref<96x256xf32, #tpu.memory_space<vmem>>) attributes {dimension_semantics = [], scalar_prefetch = 0 : i64, scratch_operands = 1 : i64, tpu.core_type = #tpu.core_type<tc>} {
    %c0 = arith.constant 0 : index
    %c0_0 = arith.constant 0 : index
    %c0_1 = arith.constant 0 : index
    %0 = vector.load %arg0[%c0, %c0_0, %c0_1] : memref<2x32x128xf32, #tpu.memory_space<vmem>>, vector<1x32x128xf32>
    %1 = vector.shape_cast %0 : vector<1x32x128xf32> to vector<32x128xf32>
    %cst = arith.constant dense<0.000000e+00> : vector<32xf32>
    %2 = vector.multi_reduction <add>, %1, %cst [1] : vector<32x128xf32> to vector<32xf32>
    %3 = vector.shape_cast %2 : vector<32xf32> to vector<32x1xf32>
    %cst_2 = arith.constant dense<0.000000e+00> : vector<1xf32>
    %4 = vector.multi_reduction <add>, %3, %cst_2 [0] : vector<32x1xf32> to vector<1xf32>
    %5 = vector.shape_cast %4 : vector<1xf32> to vector<1x1xf32>
    %cst_3 = arith.constant 2.44140625E-4 : f32
    %6 = vector.broadcast %cst_3 : f32 to vector<1x1xf32>
    %7 = arith.mulf %5, %6 : vector<1x1xf32>
    %8 = vector.broadcast %7 : vector<1x1xf32> to vector<32x128xf32>
    %9 = arith.subf %1, %8 : vector<32x128xf32>
    %10 = arith.mulf %9, %9 : vector<32x128xf32>
    %cst_4 = arith.constant dense<0.000000e+00> : vector<32xf32>
    %11 = vector.multi_reduction <add>, %10, %cst_4 [1] : vector<32x128xf32> to vector<32xf32>
    %12 = vector.shape_cast %11 : vector<32xf32> to vector<32x1xf32>
    %cst_5 = arith.constant dense<0.000000e+00> : vector<1xf32>
    %13 = vector.multi_reduction <add>, %12, %cst_5 [0] : vector<32x1xf32> to vector<1xf32>
    %14 = vector.shape_cast %13 : vector<1xf32> to vector<1x1xf32>
    %cst_6 = arith.constant 2.44200259E-4 : f32
    %15 = vector.broadcast %cst_6 : f32 to vector<1x1xf32>
    %16 = arith.mulf %14, %15 : vector<1x1xf32>
    %cst_7 = arith.constant 9.99999997E-7 : f32
    %17 = vector.broadcast %cst_7 : f32 to vector<1x1xf32>
    %18 = arith.addf %16, %17 : vector<1x1xf32>
    %19 = math.rsqrt %18 : vector<1x1xf32>
    %20 = vector.broadcast %19 : vector<1x1xf32> to vector<32x128xf32>
    %21 = arith.mulf %9, %20 : vector<32x128xf32>
    %c1 = arith.constant 1 : index
    %c0_8 = arith.constant 0 : index
    %c0_9 = arith.constant 0 : index
    %22 = vector.load %arg0[%c1, %c0_8, %c0_9] : memref<2x32x128xf32, #tpu.memory_space<vmem>>, vector<1x32x128xf32>
    %23 = vector.shape_cast %22 : vector<1x32x128xf32> to vector<32x128xf32>
    %cst_10 = arith.constant dense<0.000000e+00> : vector<32xf32>
    %24 = vector.multi_reduction <add>, %23, %cst_10 [1] : vector<32x128xf32> to vector<32xf32>
    %25 = vector.shape_cast %24 : vector<32xf32> to vector<32x1xf32>
    %cst_11 = arith.constant dense<0.000000e+00> : vector<1xf32>
    %26 = vector.multi_reduction <add>, %25, %cst_11 [0] : vector<32x1xf32> to vector<1xf32>
    %27 = vector.shape_cast %26 : vector<1xf32> to vector<1x1xf32>
    %cst_12 = arith.constant 2.44140625E-4 : f32
    %28 = vector.broadcast %cst_12 : f32 to vector<1x1xf32>
    %29 = arith.mulf %27, %28 : vector<1x1xf32>
    %30 = vector.broadcast %29 : vector<1x1xf32> to vector<32x128xf32>
    %31 = arith.subf %23, %30 : vector<32x128xf32>
    %32 = arith.mulf %31, %31 : vector<32x128xf32>
    %cst_13 = arith.constant dense<0.000000e+00> : vector<32xf32>
    %33 = vector.multi_reduction <add>, %32, %cst_13 [1] : vector<32x128xf32> to vector<32xf32>
    %34 = vector.shape_cast %33 : vector<32xf32> to vector<32x1xf32>
    %cst_14 = arith.constant dense<0.000000e+00> : vector<1xf32>
    %35 = vector.multi_reduction <add>, %34, %cst_14 [0] : vector<32x1xf32> to vector<1xf32>
    %36 = vector.shape_cast %35 : vector<1xf32> to vector<1x1xf32>
    %cst_15 = arith.constant 2.44200259E-4 : f32
    %37 = vector.broadcast %cst_15 : f32 to vector<1x1xf32>
    %38 = arith.mulf %36, %37 : vector<1x1xf32>
    %cst_16 = arith.constant 9.99999997E-7 : f32
    %39 = vector.broadcast %cst_16 : f32 to vector<1x1xf32>
    %40 = arith.addf %38, %39 : vector<1x1xf32>
    %41 = math.rsqrt %40 : vector<1x1xf32>
    %42 = vector.broadcast %41 : vector<1x1xf32> to vector<32x128xf32>
    %43 = arith.mulf %31, %42 : vector<32x128xf32>
    %44 = tpu.concatenate %21, %43 in 1 : vector<32x128xf32>, vector<32x128xf32> -> vector<32x256xf32>
    %45 = tpu.iota {dimensions = array<i32: 1>} : vector<1x256xi32>
    %c128_i32 = arith.constant 128 : i32
    %c0_i32 = arith.constant 0 : i32
    %46 = arith.cmpi eq, %c128_i32, %c0_i32 : i32
    %c1_i32 = arith.constant 1 : i32
    %47 = arith.select %46, %c1_i32, %c128_i32 : i32
    %48 = vector.broadcast %47 : i32 to vector<1x256xi32>
    %49 = arith.remsi %45, %48 : vector<1x256xi32>
    %c0_i32_17 = arith.constant 0 : i32
    %50 = vector.broadcast %c0_i32_17 : i32 to vector<1x256xi32>
    %51 = arith.cmpi ne, %49, %50 : vector<1x256xi32>
    %c0_i32_18 = arith.constant 0 : i32
    %52 = vector.broadcast %c0_i32_18 : i32 to vector<1x256xi32>
    %53 = arith.cmpi slt, %49, %52 : vector<1x256xi32>
    %c0_i32_19 = arith.constant 0 : i32
    %54 = arith.cmpi slt, %47, %c0_i32_19 : i32
    %55 = vector.broadcast %54 : i1 to vector<1x256xi1>
    %56 = vector.broadcast %55 : vector<1x256xi1> to vector<1x256xi1>
    %57 = arith.xori %53, %56 : vector<1x256xi1>
    %58 = arith.andi %57, %51 : vector<1x256xi1>
    %59 = vector.broadcast %47 : i32 to vector<1x256xi32>
    %60 = arith.addi %49, %59 : vector<1x256xi32>
    %61 = arith.select %58, %60, %49 : vector<1x256xi1>, vector<1x256xi32>
    %c0_i32_20 = arith.constant 0 : i32
    %62 = vector.broadcast %c0_i32_20 : i32 to vector<1x256xi32>
    %63 = arith.cmpi ne, %61, %62 : vector<1x256xi32>
    %c127_i32 = arith.constant 127 : i32
    %64 = vector.broadcast %c127_i32 : i32 to vector<1x256xi32>
    %65 = arith.cmpi ne, %61, %64 : vector<1x256xi32>
    %c1_i32_21 = arith.constant 1 : i32
    %66 = tpu.dynamic_rotate %44 by %c1_i32_21 dim 1 : vector<32x256xf32>, i32 -> vector<32x256xf32>
    %cst_22 = arith.constant 0.000000e+00 : f32
    %67 = vector.shape_cast %63 : vector<1x256xi1> to vector<1x256xi1>
    %68 = vector.broadcast %67 : vector<1x256xi1> to vector<32x256xi1>
    %69 = vector.broadcast %cst_22 : f32 to vector<32x256xf32>
    %70 = arith.select %68, %66, %69 : vector<32x256xi1>, vector<32x256xf32>
    %c255_i32 = arith.constant 255 : i32
    %71 = tpu.dynamic_rotate %44 by %c255_i32 dim 1 : vector<32x256xf32>, i32 -> vector<32x256xf32>
    %cst_23 = arith.constant 0.000000e+00 : f32
    %72 = vector.shape_cast %65 : vector<1x256xi1> to vector<1x256xi1>
    %73 = vector.broadcast %72 : vector<1x256xi1> to vector<32x256xi1>
    %74 = vector.broadcast %cst_23 : f32 to vector<32x256xf32>
    %75 = arith.select %73, %71, %74 : vector<32x256xi1>, vector<32x256xf32>
    %c0_24 = arith.constant 0 : index
    %c0_25 = arith.constant 0 : index
    %76 = vector.load %arg31[%c0_24, %c0_25] : memref<96x256xf32, #tpu.memory_space<vmem>>, vector<32x256xf32>
    tpu.vector_store %arg31[%c0_24, %c0_25], %70 {strides = array<i32>} : memref<96x256xf32, #tpu.memory_space<vmem>>, vector<32x256xf32>,
    %c32 = arith.constant 32 : index
    %c0_26 = arith.constant 0 : index
    %77 = vector.load %arg31[%c32, %c0_26] : memref<96x256xf32, #tpu.memory_space<vmem>>, vector<32x256xf32>
    tpu.vector_store %arg31[%c32, %c0_26], %44 {strides = array<i32>} : memref<96x256xf32, #tpu.memory_space<vmem>>, vector<32x256xf32>,
    %c64 = arith.constant 64 : index
    %c0_27 = arith.constant 0 : index
    %78 = vector.load %arg31[%c64, %c0_27] : memref<96x256xf32, #tpu.memory_space<vmem>>, vector<32x256xf32>
    tpu.vector_store %arg31[%c64, %c0_27], %75 {strides = array<i32>} : memref<96x256xf32, #tpu.memory_space<vmem>>, vector<32x256xf32>,
    %c0_28 = arith.constant 0 : index
    %c0_29 = arith.constant 0 : index
    %79 = vector.load %arg31[%c0_28, %c0_29] : memref<96x256xf32, #tpu.memory_space<vmem>>, vector<96x256xf32>
    %80 = arith.truncf %79 : vector<96x256xf32> to vector<96x256xbf16>
    %c0_30 = arith.constant 0 : index
    %c0_31 = arith.constant 0 : index
    %81 = vector.load %arg1[%c0_30, %c0_31] : memref<48x96xbf16, #tpu.memory_space<vmem>>, vector<48x96xbf16>
    %cst_32 = arith.constant dense<0.000000e+00> : vector<48x256xf32>
    %82 = tpu.matmul %81, %80, %cst_32 {dimension_numbers = #tpu.dot_dimension_numbers<[1], [0], [0], [1], [0, 0, 1, 1], [], []>} : vector<48x96xbf16>, vector<96x256xbf16>, vector<48x256xf32> -> vector<48x256xf32>
    %83 = vector.extract_strided_slice %82 {offsets = [0, 0], sizes = [32, 256], strides = [1, 1]} : vector<48x256xf32> to vector<32x256xf32>
    %84 = vector.extract_strided_slice %82 {offsets = [32, 0], sizes = [16, 256], strides = [1, 1]} : vector<48x256xf32> to vector<16x256xf32>
    %c0_33 = arith.constant 0 : index
    %c0_34 = arith.constant 0 : index
    %85 = vector.load %arg4[%c0_33, %c0_34] : memref<16x1xf32, #tpu.memory_space<vmem>>, vector<16x1xf32>
    %86 = vector.broadcast %85 : vector<16x1xf32> to vector<16x256xf32>
    %87 = arith.addf %84, %86 : vector<16x256xf32>
    %c0_35 = arith.constant 0 : index
    %c0_36 = arith.constant 0 : index
    %88 = vector.load %arg2[%c0_35, %c0_36] : memref<32x1xf32, #tpu.memory_space<vmem>>, vector<32x1xf32>
    %c0_37 = arith.constant 0 : index
    %c0_38 = arith.constant 0 : index
    %89 = vector.load %arg3[%c0_37, %c0_38] : memref<32x1xf32, #tpu.memory_space<vmem>>, vector<32x1xf32>
    %cst_39 = arith.constant dense<0.000000e+00> : vector<32xf32>
    %90 = vector.multi_reduction <add>, %83, %cst_39 [1] : vector<32x256xf32> to vector<32xf32>
    %91 = vector.shape_cast %90 : vector<32xf32> to vector<32x1xf32>
    %92 = arith.mulf %83, %83 : vector<32x256xf32>
    %cst_40 = arith.constant dense<0.000000e+00> : vector<32xf32>
    %93 = vector.multi_reduction <add>, %92, %cst_40 [1] : vector<32x256xf32> to vector<32xf32>
    %94 = vector.shape_cast %93 : vector<32xf32> to vector<32x1xf32>
    %cst_41 = arith.constant 3.906250e-03 : f32
    %95 = vector.broadcast %cst_41 : f32 to vector<32x1xf32>
    %96 = arith.mulf %91, %95 : vector<32x1xf32>
    %cst_42 = arith.constant 3.906250e-03 : f32
    %97 = vector.broadcast %cst_42 : f32 to vector<32x1xf32>
    %98 = arith.mulf %94, %97 : vector<32x1xf32>
    %99 = arith.mulf %96, %96 : vector<32x1xf32>
    %100 = arith.subf %98, %99 : vector<32x1xf32>
    %cst_43 = arith.constant 9.99999974E-6 : f32
    %101 = vector.broadcast %cst_43 : f32 to vector<32x1xf32>
    %102 = arith.addf %100, %101 : vector<32x1xf32>
    %103 = math.rsqrt %102 : vector<32x1xf32>
    %104 = arith.mulf %88, %103 : vector<32x1xf32>
    %105 = arith.mulf %96, %104 : vector<32x1xf32>
    %106 = arith.subf %89, %105 : vector<32x1xf32>
    %107 = vector.broadcast %104 : vector<32x1xf32> to vector<32x256xf32>
    %108 = arith.mulf %83, %107 : vector<32x256xf32>
    %109 = vector.broadcast %106 : vector<32x1xf32> to vector<32x256xf32>
    %110 = arith.addf %108, %109 : vector<32x256xf32>
    %cst_44 = arith.constant 0.000000e+00 : f32
    %111 = vector.broadcast %cst_44 : f32 to vector<32x256xf32>
    %112 = arith.maximumf %110, %111 : vector<32x256xf32>
    %c1_i32_45 = arith.constant 1 : i32
    %113 = tpu.dynamic_rotate %112 by %c1_i32_45 dim 1 : vector<32x256xf32>, i32 -> vector<32x256xf32>
    %cst_46 = arith.constant 0.000000e+00 : f32
    %114 = vector.shape_cast %63 : vector<1x256xi1> to vector<1x256xi1>
    %115 = vector.broadcast %114 : vector<1x256xi1> to vector<32x256xi1>
    %116 = vector.broadcast %cst_46 : f32 to vector<32x256xf32>
    %117 = arith.select %115, %113, %116 : vector<32x256xi1>, vector<32x256xf32>
    %c255_i32_47 = arith.constant 255 : i32
    %118 = tpu.dynamic_rotate %112 by %c255_i32_47 dim 1 : vector<32x256xf32>, i32 -> vector<32x256xf32>
    %cst_48 = arith.constant 0.000000e+00 : f32
    %119 = vector.shape_cast %65 : vector<1x256xi1> to vector<1x256xi1>
    %120 = vector.broadcast %119 : vector<1x256xi1> to vector<32x256xi1>
    %121 = vector.broadcast %cst_48 : f32 to vector<32x256xf32>
    %122 = arith.select %120, %118, %121 : vector<32x256xi1>, vector<32x256xf32>
    %c0_49 = arith.constant 0 : index
    %c0_50 = arith.constant 0 : index
    %123 = vector.load %arg31[%c0_49, %c0_50] : memref<96x256xf32, #tpu.memory_space<vmem>>, vector<32x256xf32>
    tpu.vector_store %arg31[%c0_49, %c0_50], %117 {strides = array<i32>} : memref<96x256xf32, #tpu.memory_space<vmem>>, vector<32x256xf32>,
    %c32_51 = arith.constant 32 : index
    %c0_52 = arith.constant 0 : index
    %124 = vector.load %arg31[%c32_51, %c0_52] : memref<96x256xf32, #tpu.memory_space<vmem>>, vector<32x256xf32>
    tpu.vector_store %arg31[%c32_51, %c0_52], %112 {strides = array<i32>} : memref<96x256xf32, #tpu.memory_space<vmem>>, vector<32x256xf32>,
    %c64_53 = arith.constant 64 : index
    %c0_54 = arith.constant 0 : index
    %125 = vector.load %arg31[%c64_53, %c0_54] : memref<96x256xf32, #tpu.memory_space<vmem>>, vector<32x256xf32>
    tpu.vector_store %arg31[%c64_53, %c0_54], %122 {strides = array<i32>} : memref<96x256xf32, #tpu.memory_space<vmem>>, vector<32x256xf32>,
    %c0_55 = arith.constant 0 : index
    %c0_56 = arith.constant 0 : index
    %126 = vector.load %arg31[%c0_55, %c0_56] : memref<96x256xf32, #tpu.memory_space<vmem>>, vector<96x256xf32>
    %127 = arith.truncf %126 : vector<96x256xf32> to vector<96x256xbf16>
    %c0_57 = arith.constant 0 : index
    %c0_58 = arith.constant 0 : index
    %128 = vector.load %arg5[%c0_57, %c0_58] : memref<16x96xbf16, #tpu.memory_space<vmem>>, vector<16x96xbf16>
    %cst_59 = arith.constant dense<0.000000e+00> : vector<16x256xf32>
    %129 = tpu.matmul %128, %127, %cst_59 {dimension_numbers = #tpu.dot_dimension_numbers<[1], [0], [0], [1], [0, 0, 1, 1], [], []>} : vector<16x96xbf16>, vector<96x256xbf16>, vector<16x256xf32> -> vector<16x256xf32>
    %c0_60 = arith.constant 0 : index
    %c0_61 = arith.constant 0 : index
    %130 = vector.load %arg6[%c0_60, %c0_61] : memref<16x1xf32, #tpu.memory_space<vmem>>, vector<16x1xf32>
    %c0_62 = arith.constant 0 : index
    %c0_63 = arith.constant 0 : index
    %131 = vector.load %arg7[%c0_62, %c0_63] : memref<16x1xf32, #tpu.memory_space<vmem>>, vector<16x1xf32>
    %cst_64 = arith.constant dense<0.000000e+00> : vector<16xf32>
    %132 = vector.multi_reduction <add>, %129, %cst_64 [1] : vector<16x256xf32> to vector<16xf32>
    %133 = vector.shape_cast %132 : vector<16xf32> to vector<16x1xf32>
    %134 = arith.mulf %129, %129 : vector<16x256xf32>
    %cst_65 = arith.constant dense<0.000000e+00> : vector<16xf32>
    %135 = vector.multi_reduction <add>, %134, %cst_65 [1] : vector<16x256xf32> to vector<16xf32>
    %136 = vector.shape_cast %135 : vector<16xf32> to vector<16x1xf32>
    %cst_66 = arith.constant 3.906250e-03 : f32
    %137 = vector.broadcast %cst_66 : f32 to vector<16x1xf32>
    %138 = arith.mulf %133, %137 : vector<16x1xf32>
    %cst_67 = arith.constant 3.906250e-03 : f32
    %139 = vector.broadcast %cst_67 : f32 to vector<16x1xf32>
    %140 = arith.mulf %136, %139 : vector<16x1xf32>
    %141 = arith.mulf %138, %138 : vector<16x1xf32>
    %142 = arith.subf %140, %141 : vector<16x1xf32>
    %cst_68 = arith.constant 9.99999974E-6 : f32
    %143 = vector.broadcast %cst_68 : f32 to vector<16x1xf32>
    %144 = arith.addf %142, %143 : vector<16x1xf32>
    %145 = math.rsqrt %144 : vector<16x1xf32>
    %146 = arith.mulf %130, %145 : vector<16x1xf32>
    %147 = arith.mulf %138, %146 : vector<16x1xf32>
    %148 = arith.subf %131, %147 : vector<16x1xf32>
    %149 = vector.broadcast %146 : vector<16x1xf32> to vector<16x256xf32>
    %150 = arith.mulf %129, %149 : vector<16x256xf32>
    %151 = vector.broadcast %148 : vector<16x1xf32> to vector<16x256xf32>
    %152 = arith.addf %150, %151 : vector<16x256xf32>
    %153 = arith.addf %152, %87 : vector<16x256xf32>
    %c1_i32_69 = arith.constant 1 : i32
    %154 = tpu.dynamic_rotate %153 by %c1_i32_69 dim 1 : vector<16x256xf32>, i32 -> vector<16x256xf32>
    %cst_70 = arith.constant 0.000000e+00 : f32
    %155 = vector.shape_cast %63 : vector<1x256xi1> to vector<1x256xi1>
    %156 = vector.broadcast %155 : vector<1x256xi1> to vector<16x256xi1>
    %157 = vector.broadcast %cst_70 : f32 to vector<16x256xf32>
    %158 = arith.select %156, %154, %157 : vector<16x256xi1>, vector<16x256xf32>
    %c255_i32_71 = arith.constant 255 : i32
    %159 = tpu.dynamic_rotate %153 by %c255_i32_71 dim 1 : vector<16x256xf32>, i32 -> vector<16x256xf32>
    %cst_72 = arith.constant 0.000000e+00 : f32
    %160 = vector.shape_cast %65 : vector<1x256xi1> to vector<1x256xi1>
    %161 = vector.broadcast %160 : vector<1x256xi1> to vector<16x256xi1>
    %162 = vector.broadcast %cst_72 : f32 to vector<16x256xf32>
    %163 = arith.select %161, %159, %162 : vector<16x256xi1>, vector<16x256xf32>
    %c0_73 = arith.constant 0 : index
    %c0_74 = arith.constant 0 : index
    %164 = vector.load %arg31[%c0_73, %c0_74] : memref<96x256xf32, #tpu.memory_space<vmem>>, vector<16x256xf32>
    tpu.vector_store %arg31[%c0_73, %c0_74], %158 {strides = array<i32>} : memref<96x256xf32, #tpu.memory_space<vmem>>, vector<16x256xf32>,
    %c16 = arith.constant 16 : index
    %c0_75 = arith.constant 0 : index
    %165 = vector.load %arg31[%c16, %c0_75] : memref<96x256xf32, #tpu.memory_space<vmem>>, vector<16x256xf32>
    tpu.vector_store %arg31[%c16, %c0_75], %153 {strides = array<i32>} : memref<96x256xf32, #tpu.memory_space<vmem>>, vector<16x256xf32>,
    %c32_76 = arith.constant 32 : index
    %c0_77 = arith.constant 0 : index
    %166 = vector.load %arg31[%c32_76, %c0_77] : memref<96x256xf32, #tpu.memory_space<vmem>>, vector<16x256xf32>
    tpu.vector_store %arg31[%c32_76, %c0_77], %163 {strides = array<i32>} : memref<96x256xf32, #tpu.memory_space<vmem>>, vector<16x256xf32>,
    %c0_78 = arith.constant 0 : index
    %c0_79 = arith.constant 0 : index
    %167 = vector.load %arg31[%c0_78, %c0_79] : memref<96x256xf32, #tpu.memory_space<vmem>>, vector<48x256xf32>
    %168 = arith.truncf %167 : vector<48x256xf32> to vector<48x256xbf16>
    %c0_80 = arith.constant 0 : index
    %c0_81 = arith.constant 0 : index
    %169 = vector.load %arg8[%c0_80, %c0_81] : memref<24x48xbf16, #tpu.memory_space<vmem>>, vector<24x48xbf16>
    %cst_82 = arith.constant dense<0.000000e+00> : vector<24x256xf32>
    %170 = tpu.matmul %169, %168, %cst_82 {dimension_numbers = #tpu.dot_dimension_numbers<[1], [0], [0], [1], [0, 0, 1, 1], [], []>} : vector<24x48xbf16>, vector<48x256xbf16>, vector<24x256xf32> -> vector<24x256xf32>
    %171 = vector.extract_strided_slice %170 {offsets = [0, 0], sizes = [16, 256], strides = [1, 1]} : vector<24x256xf32> to vector<16x256xf32>
    %172 = vector.extract_strided_slice %170 {offsets = [16, 0], sizes = [8, 256], strides = [1, 1]} : vector<24x256xf32> to vector<8x256xf32>
    %c0_83 = arith.constant 0 : index
    %c0_84 = arith.constant 0 : index
    %173 = vector.load %arg11[%c0_83, %c0_84] : memref<8x1xf32, #tpu.memory_space<vmem>>, vector<8x1xf32>
    %174 = vector.broadcast %173 : vector<8x1xf32> to vector<8x256xf32>
    %175 = arith.addf %172, %174 : vector<8x256xf32>
    %c0_85 = arith.constant 0 : index
    %c0_86 = arith.constant 0 : index
    %176 = vector.load %arg9[%c0_85, %c0_86] : memref<16x1xf32, #tpu.memory_space<vmem>>, vector<16x1xf32>
    %c0_87 = arith.constant 0 : index
    %c0_88 = arith.constant 0 : index
    %177 = vector.load %arg10[%c0_87, %c0_88] : memref<16x1xf32, #tpu.memory_space<vmem>>, vector<16x1xf32>
    %cst_89 = arith.constant dense<0.000000e+00> : vector<16xf32>
    %178 = vector.multi_reduction <add>, %171, %cst_89 [1] : vector<16x256xf32> to vector<16xf32>
    %179 = vector.shape_cast %178 : vector<16xf32> to vector<16x1xf32>
    %180 = arith.mulf %171, %171 : vector<16x256xf32>
    %cst_90 = arith.constant dense<0.000000e+00> : vector<16xf32>
    %181 = vector.multi_reduction <add>, %180, %cst_90 [1] : vector<16x256xf32> to vector<16xf32>
    %182 = vector.shape_cast %181 : vector<16xf32> to vector<16x1xf32>
    %cst_91 = arith.constant 3.906250e-03 : f32
    %183 = vector.broadcast %cst_91 : f32 to vector<16x1xf32>
    %184 = arith.mulf %179, %183 : vector<16x1xf32>
    %cst_92 = arith.constant 3.906250e-03 : f32
    %185 = vector.broadcast %cst_92 : f32 to vector<16x1xf32>
    %186 = arith.mulf %182, %185 : vector<16x1xf32>
    %187 = arith.mulf %184, %184 : vector<16x1xf32>
    %188 = arith.subf %186, %187 : vector<16x1xf32>
    %cst_93 = arith.constant 9.99999974E-6 : f32
    %189 = vector.broadcast %cst_93 : f32 to vector<16x1xf32>
    %190 = arith.addf %188, %189 : vector<16x1xf32>
    %191 = math.rsqrt %190 : vector<16x1xf32>
    %192 = arith.mulf %176, %191 : vector<16x1xf32>
    %193 = arith.mulf %184, %192 : vector<16x1xf32>
    %194 = arith.subf %177, %193 : vector<16x1xf32>
    %195 = vector.broadcast %192 : vector<16x1xf32> to vector<16x256xf32>
    %196 = arith.mulf %171, %195 : vector<16x256xf32>
    %197 = vector.broadcast %194 : vector<16x1xf32> to vector<16x256xf32>
    %198 = arith.addf %196, %197 : vector<16x256xf32>
    %cst_94 = arith.constant 0.000000e+00 : f32
    %199 = vector.broadcast %cst_94 : f32 to vector<16x256xf32>
    %200 = arith.maximumf %198, %199 : vector<16x256xf32>
    %c1_i32_95 = arith.constant 1 : i32
    %201 = tpu.dynamic_rotate %200 by %c1_i32_95 dim 1 : vector<16x256xf32>, i32 -> vector<16x256xf32>
    %cst_96 = arith.constant 0.000000e+00 : f32
    %202 = vector.shape_cast %63 : vector<1x256xi1> to vector<1x256xi1>
    %203 = vector.broadcast %202 : vector<1x256xi1> to vector<16x256xi1>
    %204 = vector.broadcast %cst_96 : f32 to vector<16x256xf32>
    %205 = arith.select %203, %201, %204 : vector<16x256xi1>, vector<16x256xf32>
    %c255_i32_97 = arith.constant 255 : i32
    %206 = tpu.dynamic_rotate %200 by %c255_i32_97 dim 1 : vector<16x256xf32>, i32 -> vector<16x256xf32>
    %cst_98 = arith.constant 0.000000e+00 : f32
    %207 = vector.shape_cast %65 : vector<1x256xi1> to vector<1x256xi1>
    %208 = vector.broadcast %207 : vector<1x256xi1> to vector<16x256xi1>
    %209 = vector.broadcast %cst_98 : f32 to vector<16x256xf32>
    %210 = arith.select %208, %206, %209 : vector<16x256xi1>, vector<16x256xf32>
    %c0_99 = arith.constant 0 : index
    %c0_100 = arith.constant 0 : index
    %211 = vector.load %arg31[%c0_99, %c0_100] : memref<96x256xf32, #tpu.memory_space<vmem>>, vector<16x256xf32>
    tpu.vector_store %arg31[%c0_99, %c0_100], %205 {strides = array<i32>} : memref<96x256xf32, #tpu.memory_space<vmem>>, vector<16x256xf32>,
    %c16_101 = arith.constant 16 : index
    %c0_102 = arith.constant 0 : index
    %212 = vector.load %arg31[%c16_101, %c0_102] : memref<96x256xf32, #tpu.memory_space<vmem>>, vector<16x256xf32>
    tpu.vector_store %arg31[%c16_101, %c0_102], %200 {strides = array<i32>} : memref<96x256xf32, #tpu.memory_space<vmem>>, vector<16x256xf32>,
    %c32_103 = arith.constant 32 : index
    %c0_104 = arith.constant 0 : index
    %213 = vector.load %arg31[%c32_103, %c0_104] : memref<96x256xf32, #tpu.memory_space<vmem>>, vector<16x256xf32>
    tpu.vector_store %arg31[%c32_103, %c0_104], %210 {strides = array<i32>} : memref<96x256xf32, #tpu.memory_space<vmem>>, vector<16x256xf32>,
    %c0_105 = arith.constant 0 : index
    %c0_106 = arith.constant 0 : index
    %214 = vector.load %arg31[%c0_105, %c0_106] : memref<96x256xf32, #tpu.memory_space<vmem>>, vector<48x256xf32>
    %215 = arith.truncf %214 : vector<48x256xf32> to vector<48x256xbf16>
    %c0_107 = arith.constant 0 : index
    %c0_108 = arith.constant 0 : index
    %216 = vector.load %arg12[%c0_107, %c0_108] : memref<8x48xbf16, #tpu.memory_space<vmem>>, vector<8x48xbf16>
    %cst_109 = arith.constant dense<0.000000e+00> : vector<8x256xf32>
    %217 = tpu.matmul %216, %215, %cst_109 {dimension_numbers = #tpu.dot_dimension_numbers<[1], [0], [0], [1], [0, 0, 1, 1], [], []>} : vector<8x48xbf16>, vector<48x256xbf16>, vector<8x256xf32> -> vector<8x256xf32>
    %c0_110 = arith.constant 0 : index
    %c0_111 = arith.constant 0 : index
    %218 = vector.load %arg13[%c0_110, %c0_111] : memref<8x1xf32, #tpu.memory_space<vmem>>, vector<8x1xf32>
    %c0_112 = arith.constant 0 : index
    %c0_113 = arith.constant 0 : index
    %219 = vector.load %arg14[%c0_112, %c0_113] : memref<8x1xf32, #tpu.memory_space<vmem>>, vector<8x1xf32>
    %cst_114 = arith.constant dense<0.000000e+00> : vector<8xf32>
    %220 = vector.multi_reduction <add>, %217, %cst_114 [1] : vector<8x256xf32> to vector<8xf32>
    %221 = vector.shape_cast %220 : vector<8xf32> to vector<8x1xf32>
    %222 = arith.mulf %217, %217 : vector<8x256xf32>
    %cst_115 = arith.constant dense<0.000000e+00> : vector<8xf32>
    %223 = vector.multi_reduction <add>, %222, %cst_115 [1] : vector<8x256xf32> to vector<8xf32>
    %224 = vector.shape_cast %223 : vector<8xf32> to vector<8x1xf32>
    %cst_116 = arith.constant 3.906250e-03 : f32
    %225 = vector.broadcast %cst_116 : f32 to vector<8x1xf32>
    %226 = arith.mulf %221, %225 : vector<8x1xf32>
    %cst_117 = arith.constant 3.906250e-03 : f32
    %227 = vector.broadcast %cst_117 : f32 to vector<8x1xf32>
    %228 = arith.mulf %224, %227 : vector<8x1xf32>
    %229 = arith.mulf %226, %226 : vector<8x1xf32>
    %230 = arith.subf %228, %229 : vector<8x1xf32>
    %cst_118 = arith.constant 9.99999974E-6 : f32
    %231 = vector.broadcast %cst_118 : f32 to vector<8x1xf32>
    %232 = arith.addf %230, %231 : vector<8x1xf32>
    %233 = math.rsqrt %232 : vector<8x1xf32>
    %234 = arith.mulf %218, %233 : vector<8x1xf32>
    %235 = arith.mulf %226, %234 : vector<8x1xf32>
    %236 = arith.subf %219, %235 : vector<8x1xf32>
    %237 = vector.broadcast %234 : vector<8x1xf32> to vector<8x256xf32>
    %238 = arith.mulf %217, %237 : vector<8x256xf32>
    %239 = vector.broadcast %236 : vector<8x1xf32> to vector<8x256xf32>
    %240 = arith.addf %238, %239 : vector<8x256xf32>
    %241 = arith.addf %240, %175 : vector<8x256xf32>
    %242 = vector.extract_strided_slice %241 {offsets = [0, 0], sizes = [8, 128], strides = [1, 1]} : vector<8x256xf32> to vector<8x128xf32>
    %c0_119 = arith.constant 0 : index
    %c0_120 = arith.constant 0 : index
    %c0_121 = arith.constant 0 : index
    %243 = vector.load %arg30[%c0_119, %c0_120, %c0_121] : memref<2x8x128xf32, #tpu.memory_space<vmem>>, vector<1x8x128xf32>
    %244 = vector.shape_cast %243 : vector<1x8x128xf32> to vector<8x128xf32>
    %245 = vector.shape_cast %242 : vector<8x128xf32> to vector<1x8x128xf32>
    tpu.vector_store %arg30[%c0_119, %c0_120, %c0_121], %245 {strides = array<i32>} : memref<2x8x128xf32, #tpu.memory_space<vmem>>, vector<1x8x128xf32>,
    %246 = vector.extract_strided_slice %241 {offsets = [0, 128], sizes = [8, 128], strides = [1, 1]} : vector<8x256xf32> to vector<8x128xf32>
    %c1_122 = arith.constant 1 : index
    %c0_123 = arith.constant 0 : index
    %c0_124 = arith.constant 0 : index
    %247 = vector.load %arg30[%c1_122, %c0_123, %c0_124] : memref<2x8x128xf32, #tpu.memory_space<vmem>>, vector<1x8x128xf32>
    %248 = vector.shape_cast %247 : vector<1x8x128xf32> to vector<8x128xf32>
    %249 = vector.shape_cast %246 : vector<8x128xf32> to vector<1x8x128xf32>
    tpu.vector_store %arg30[%c1_122, %c0_123, %c0_124], %249 {strides = array<i32>} : memref<2x8x128xf32, #tpu.memory_space<vmem>>, vector<1x8x128xf32>,
    %c1_i32_125 = arith.constant 1 : i32
    %250 = tpu.dynamic_rotate %241 by %c1_i32_125 dim 1 : vector<8x256xf32>, i32 -> vector<8x256xf32>
    %cst_126 = arith.constant 0.000000e+00 : f32
    %251 = vector.shape_cast %63 : vector<1x256xi1> to vector<1x256xi1>
    %252 = vector.broadcast %251 : vector<1x256xi1> to vector<8x256xi1>
    %253 = vector.broadcast %cst_126 : f32 to vector<8x256xf32>
    %254 = arith.select %252, %250, %253 : vector<8x256xi1>, vector<8x256xf32>
    %c255_i32_127 = arith.constant 255 : i32
    %255 = tpu.dynamic_rotate %241 by %c255_i32_127 dim 1 : vector<8x256xf32>, i32 -> vector<8x256xf32>
    %cst_128 = arith.constant 0.000000e+00 : f32
    %256 = vector.shape_cast %65 : vector<1x256xi1> to vector<1x256xi1>
    %257 = vector.broadcast %256 : vector<1x256xi1> to vector<8x256xi1>
    %258 = vector.broadcast %cst_128 : f32 to vector<8x256xf32>
    %259 = arith.select %257, %255, %258 : vector<8x256xi1>, vector<8x256xf32>
    %c0_129 = arith.constant 0 : index
    %c0_130 = arith.constant 0 : index
    %260 = vector.load %arg31[%c0_129, %c0_130] : memref<96x256xf32, #tpu.memory_space<vmem>>, vector<8x256xf32>
    tpu.vector_store %arg31[%c0_129, %c0_130], %254 {strides = array<i32>} : memref<96x256xf32, #tpu.memory_space<vmem>>, vector<8x256xf32>,
    %c8 = arith.constant 8 : index
    %c0_131 = arith.constant 0 : index
    %261 = vector.load %arg31[%c8, %c0_131] : memref<96x256xf32, #tpu.memory_space<vmem>>, vector<8x256xf32>
    tpu.vector_store %arg31[%c8, %c0_131], %241 {strides = array<i32>} : memref<96x256xf32, #tpu.memory_space<vmem>>, vector<8x256xf32>,
    %c16_132 = arith.constant 16 : index
    %c0_133 = arith.constant 0 : index
    %262 = vector.load %arg31[%c16_132, %c0_133] : memref<96x256xf32, #tpu.memory_space<vmem>>, vector<8x256xf32>
    tpu.vector_store %arg31[%c16_132, %c0_133], %259 {strides = array<i32>} : memref<96x256xf32, #tpu.memory_space<vmem>>, vector<8x256xf32>,
    %c0_134 = arith.constant 0 : index
    %c0_135 = arith.constant 0 : index
    %263 = vector.load %arg31[%c0_134, %c0_135] : memref<96x256xf32, #tpu.memory_space<vmem>>, vector<24x256xf32>
    %264 = arith.truncf %263 : vector<24x256xf32> to vector<24x256xbf16>
    %c0_136 = arith.constant 0 : index
    %c0_137 = arith.constant 0 : index
    %265 = vector.load %arg15[%c0_136, %c0_137] : memref<24x24xbf16, #tpu.memory_space<vmem>>, vector<24x24xbf16>
    %cst_138 = arith.constant dense<0.000000e+00> : vector<24x256xf32>
    %266 = tpu.matmul %265, %264, %cst_138 {dimension_numbers = #tpu.dot_dimension_numbers<[1], [0], [0], [1], [0, 0, 1, 1], [], []>} : vector<24x24xbf16>, vector<24x256xbf16>, vector<24x256xf32> -> vector<24x256xf32>
    %267 = vector.extract_strided_slice %266 {offsets = [0, 0], sizes = [8, 256], strides = [1, 1]} : vector<24x256xf32> to vector<8x256xf32>
    %268 = vector.extract_strided_slice %266 {offsets = [8, 0], sizes = [16, 256], strides = [1, 1]} : vector<24x256xf32> to vector<16x256xf32>
    %c0_139 = arith.constant 0 : index
    %c0_140 = arith.constant 0 : index
    %269 = vector.load %arg18[%c0_139, %c0_140] : memref<16x1xf32, #tpu.memory_space<vmem>>, vector<16x1xf32>
    %270 = vector.broadcast %269 : vector<16x1xf32> to vector<16x256xf32>
    %271 = arith.addf %268, %270 : vector<16x256xf32>
    %c0_141 = arith.constant 0 : index
    %c0_142 = arith.constant 0 : index
    %272 = vector.load %arg16[%c0_141, %c0_142] : memref<8x1xf32, #tpu.memory_space<vmem>>, vector<8x1xf32>
    %c0_143 = arith.constant 0 : index
    %c0_144 = arith.constant 0 : index
    %273 = vector.load %arg17[%c0_143, %c0_144] : memref<8x1xf32, #tpu.memory_space<vmem>>, vector<8x1xf32>
    %cst_145 = arith.constant dense<0.000000e+00> : vector<8xf32>
    %274 = vector.multi_reduction <add>, %267, %cst_145 [1] : vector<8x256xf32> to vector<8xf32>
    %275 = vector.shape_cast %274 : vector<8xf32> to vector<8x1xf32>
    %276 = arith.mulf %267, %267 : vector<8x256xf32>
    %cst_146 = arith.constant dense<0.000000e+00> : vector<8xf32>
    %277 = vector.multi_reduction <add>, %276, %cst_146 [1] : vector<8x256xf32> to vector<8xf32>
    %278 = vector.shape_cast %277 : vector<8xf32> to vector<8x1xf32>
    %cst_147 = arith.constant 3.906250e-03 : f32
    %279 = vector.broadcast %cst_147 : f32 to vector<8x1xf32>
    %280 = arith.mulf %275, %279 : vector<8x1xf32>
    %cst_148 = arith.constant 3.906250e-03 : f32
    %281 = vector.broadcast %cst_148 : f32 to vector<8x1xf32>
    %282 = arith.mulf %278, %281 : vector<8x1xf32>
    %283 = arith.mulf %280, %280 : vector<8x1xf32>
    %284 = arith.subf %282, %283 : vector<8x1xf32>
    %cst_149 = arith.constant 9.99999974E-6 : f32
    %285 = vector.broadcast %cst_149 : f32 to vector<8x1xf32>
    %286 = arith.addf %284, %285 : vector<8x1xf32>
    %287 = math.rsqrt %286 : vector<8x1xf32>
    %288 = arith.mulf %272, %287 : vector<8x1xf32>
    %289 = arith.mulf %280, %288 : vector<8x1xf32>
    %290 = arith.subf %273, %289 : vector<8x1xf32>
    %291 = vector.broadcast %288 : vector<8x1xf32> to vector<8x256xf32>
    %292 = arith.mulf %267, %291 : vector<8x256xf32>
    %293 = vector.broadcast %290 : vector<8x1xf32> to vector<8x256xf32>
    %294 = arith.addf %292, %293 : vector<8x256xf32>
    %cst_150 = arith.constant 0.000000e+00 : f32
    %295 = vector.broadcast %cst_150 : f32 to vector<8x256xf32>
    %296 = arith.maximumf %294, %295 : vector<8x256xf32>
    %c1_i32_151 = arith.constant 1 : i32
    %297 = tpu.dynamic_rotate %296 by %c1_i32_151 dim 1 : vector<8x256xf32>, i32 -> vector<8x256xf32>
    %cst_152 = arith.constant 0.000000e+00 : f32
    %298 = vector.shape_cast %63 : vector<1x256xi1> to vector<1x256xi1>
    %299 = vector.broadcast %298 : vector<1x256xi1> to vector<8x256xi1>
    %300 = vector.broadcast %cst_152 : f32 to vector<8x256xf32>
    %301 = arith.select %299, %297, %300 : vector<8x256xi1>, vector<8x256xf32>
    %c255_i32_153 = arith.constant 255 : i32
    %302 = tpu.dynamic_rotate %296 by %c255_i32_153 dim 1 : vector<8x256xf32>, i32 -> vector<8x256xf32>
    %cst_154 = arith.constant 0.000000e+00 : f32
    %303 = vector.shape_cast %65 : vector<1x256xi1> to vector<1x256xi1>
    %304 = vector.broadcast %303 : vector<1x256xi1> to vector<8x256xi1>
    %305 = vector.broadcast %cst_154 : f32 to vector<8x256xf32>
    %306 = arith.select %304, %302, %305 : vector<8x256xi1>, vector<8x256xf32>
    %c0_155 = arith.constant 0 : index
    %c0_156 = arith.constant 0 : index
    %307 = vector.load %arg31[%c0_155, %c0_156] : memref<96x256xf32, #tpu.memory_space<vmem>>, vector<8x256xf32>
    tpu.vector_store %arg31[%c0_155, %c0_156], %301 {strides = array<i32>} : memref<96x256xf32, #tpu.memory_space<vmem>>, vector<8x256xf32>,
    %c8_157 = arith.constant 8 : index
    %c0_158 = arith.constant 0 : index
    %308 = vector.load %arg31[%c8_157, %c0_158] : memref<96x256xf32, #tpu.memory_space<vmem>>, vector<8x256xf32>
    tpu.vector_store %arg31[%c8_157, %c0_158], %296 {strides = array<i32>} : memref<96x256xf32, #tpu.memory_space<vmem>>, vector<8x256xf32>,
    %c16_159 = arith.constant 16 : index
    %c0_160 = arith.constant 0 : index
    %309 = vector.load %arg31[%c16_159, %c0_160] : memref<96x256xf32, #tpu.memory_space<vmem>>, vector<8x256xf32>
    tpu.vector_store %arg31[%c16_159, %c0_160], %306 {strides = array<i32>} : memref<96x256xf32, #tpu.memory_space<vmem>>, vector<8x256xf32>,
    %c0_161 = arith.constant 0 : index
    %c0_162 = arith.constant 0 : index
    %310 = vector.load %arg31[%c0_161, %c0_162] : memref<96x256xf32, #tpu.memory_space<vmem>>, vector<24x256xf32>
    %311 = arith.truncf %310 : vector<24x256xf32> to vector<24x256xbf16>
    %c0_163 = arith.constant 0 : index
    %c0_164 = arith.constant 0 : index
    %312 = vector.load %arg19[%c0_163, %c0_164] : memref<16x24xbf16, #tpu.memory_space<vmem>>, vector<16x24xbf16>
    %cst_165 = arith.constant dense<0.000000e+00> : vector<16x256xf32>
    %313 = tpu.matmul %312, %311, %cst_165 {dimension_numbers = #tpu.dot_dimension_numbers<[1], [0], [0], [1], [0, 0, 1, 1], [], []>} : vector<16x24xbf16>, vector<24x256xbf16>, vector<16x256xf32> -> vector<16x256xf32>
    %c0_166 = arith.constant 0 : index
    %c0_167 = arith.constant 0 : index
    %314 = vector.load %arg20[%c0_166, %c0_167] : memref<16x1xf32, #tpu.memory_space<vmem>>, vector<16x1xf32>
    %c0_168 = arith.constant 0 : index
    %c0_169 = arith.constant 0 : index
    %315 = vector.load %arg21[%c0_168, %c0_169] : memref<16x1xf32, #tpu.memory_space<vmem>>, vector<16x1xf32>
    %cst_170 = arith.constant dense<0.000000e+00> : vector<16xf32>
    %316 = vector.multi_reduction <add>, %313, %cst_170 [1] : vector<16x256xf32> to vector<16xf32>
    %317 = vector.shape_cast %316 : vector<16xf32> to vector<16x1xf32>
    %318 = arith.mulf %313, %313 : vector<16x256xf32>
    %cst_171 = arith.constant dense<0.000000e+00> : vector<16xf32>
    %319 = vector.multi_reduction <add>, %318, %cst_171 [1] : vector<16x256xf32> to vector<16xf32>
    %320 = vector.shape_cast %319 : vector<16xf32> to vector<16x1xf32>
    %cst_172 = arith.constant 3.906250e-03 : f32
    %321 = vector.broadcast %cst_172 : f32 to vector<16x1xf32>
    %322 = arith.mulf %317, %321 : vector<16x1xf32>
    %cst_173 = arith.constant 3.906250e-03 : f32
    %323 = vector.broadcast %cst_173 : f32 to vector<16x1xf32>
    %324 = arith.mulf %320, %323 : vector<16x1xf32>
    %325 = arith.mulf %322, %322 : vector<16x1xf32>
    %326 = arith.subf %324, %325 : vector<16x1xf32>
    %cst_174 = arith.constant 9.99999974E-6 : f32
    %327 = vector.broadcast %cst_174 : f32 to vector<16x1xf32>
    %328 = arith.addf %326, %327 : vector<16x1xf32>
    %329 = math.rsqrt %328 : vector<16x1xf32>
    %330 = arith.mulf %314, %329 : vector<16x1xf32>
    %331 = arith.mulf %322, %330 : vector<16x1xf32>
    %332 = arith.subf %315, %331 : vector<16x1xf32>
    %333 = vector.broadcast %330 : vector<16x1xf32> to vector<16x256xf32>
    %334 = arith.mulf %313, %333 : vector<16x256xf32>
    %335 = vector.broadcast %332 : vector<16x1xf32> to vector<16x256xf32>
    %336 = arith.addf %334, %335 : vector<16x256xf32>
    %337 = arith.addf %336, %271 : vector<16x256xf32>
    %c1_i32_175 = arith.constant 1 : i32
    %338 = tpu.dynamic_rotate %337 by %c1_i32_175 dim 1 : vector<16x256xf32>, i32 -> vector<16x256xf32>
    %cst_176 = arith.constant 0.000000e+00 : f32
    %339 = vector.shape_cast %63 : vector<1x256xi1> to vector<1x256xi1>
    %340 = vector.broadcast %339 : vector<1x256xi1> to vector<16x256xi1>
    %341 = vector.broadcast %cst_176 : f32 to vector<16x256xf32>
    %342 = arith.select %340, %338, %341 : vector<16x256xi1>, vector<16x256xf32>
    %c255_i32_177 = arith.constant 255 : i32
    %343 = tpu.dynamic_rotate %337 by %c255_i32_177 dim 1 : vector<16x256xf32>, i32 -> vector<16x256xf32>
    %cst_178 = arith.constant 0.000000e+00 : f32
    %344 = vector.shape_cast %65 : vector<1x256xi1> to vector<1x256xi1>
    %345 = vector.broadcast %344 : vector<1x256xi1> to vector<16x256xi1>
    %346 = vector.broadcast %cst_178 : f32 to vector<16x256xf32>
    %347 = arith.select %345, %343, %346 : vector<16x256xi1>, vector<16x256xf32>
    %c0_179 = arith.constant 0 : index
    %c0_180 = arith.constant 0 : index
    %348 = vector.load %arg31[%c0_179, %c0_180] : memref<96x256xf32, #tpu.memory_space<vmem>>, vector<16x256xf32>
    tpu.vector_store %arg31[%c0_179, %c0_180], %342 {strides = array<i32>} : memref<96x256xf32, #tpu.memory_space<vmem>>, vector<16x256xf32>,
    %c16_181 = arith.constant 16 : index
    %c0_182 = arith.constant 0 : index
    %349 = vector.load %arg31[%c16_181, %c0_182] : memref<96x256xf32, #tpu.memory_space<vmem>>, vector<16x256xf32>
    tpu.vector_store %arg31[%c16_181, %c0_182], %337 {strides = array<i32>} : memref<96x256xf32, #tpu.memory_space<vmem>>, vector<16x256xf32>,
    %c32_183 = arith.constant 32 : index
    %c0_184 = arith.constant 0 : index
    %350 = vector.load %arg31[%c32_183, %c0_184] : memref<96x256xf32, #tpu.memory_space<vmem>>, vector<16x256xf32>
    tpu.vector_store %arg31[%c32_183, %c0_184], %347 {strides = array<i32>} : memref<96x256xf32, #tpu.memory_space<vmem>>, vector<16x256xf32>,
    %c0_185 = arith.constant 0 : index
    %c0_186 = arith.constant 0 : index
    %351 = vector.load %arg31[%c0_185, %c0_186] : memref<96x256xf32, #tpu.memory_space<vmem>>, vector<48x256xf32>
    %352 = arith.truncf %351 : vector<48x256xf32> to vector<48x256xbf16>
    %c0_187 = arith.constant 0 : index
    %c0_188 = arith.constant 0 : index
    %353 = vector.load %arg22[%c0_187, %c0_188] : memref<48x48xbf16, #tpu.memory_space<vmem>>, vector<48x48xbf16>
    %cst_189 = arith.constant dense<0.000000e+00> : vector<48x256xf32>
    %354 = tpu.matmul %353, %352, %cst_189 {dimension_numbers = #tpu.dot_dimension_numbers<[1], [0], [0], [1], [0, 0, 1, 1], [], []>} : vector<48x48xbf16>, vector<48x256xbf16>, vector<48x256xf32> -> vector<48x256xf32>
    %355 = vector.extract_strided_slice %354 {offsets = [0, 0], sizes = [16, 256], strides = [1, 1]} : vector<48x256xf32> to vector<16x256xf32>
    %356 = vector.extract_strided_slice %354 {offsets = [16, 0], sizes = [32, 256], strides = [1, 1]} : vector<48x256xf32> to vector<32x256xf32>
    %c0_190 = arith.constant 0 : index
    %c0_191 = arith.constant 0 : index
    %357 = vector.load %arg25[%c0_190, %c0_191] : memref<32x1xf32, #tpu.memory_space<vmem>>, vector<32x1xf32>
    %358 = vector.broadcast %357 : vector<32x1xf32> to vector<32x256xf32>
    %359 = arith.addf %356, %358 : vector<32x256xf32>
    %c0_192 = arith.constant 0 : index
    %c0_193 = arith.constant 0 : index
    %360 = vector.load %arg23[%c0_192, %c0_193] : memref<16x1xf32, #tpu.memory_space<vmem>>, vector<16x1xf32>
    %c0_194 = arith.constant 0 : index
    %c0_195 = arith.constant 0 : index
    %361 = vector.load %arg24[%c0_194, %c0_195] : memref<16x1xf32, #tpu.memory_space<vmem>>, vector<16x1xf32>
    %cst_196 = arith.constant dense<0.000000e+00> : vector<16xf32>
    %362 = vector.multi_reduction <add>, %355, %cst_196 [1] : vector<16x256xf32> to vector<16xf32>
    %363 = vector.shape_cast %362 : vector<16xf32> to vector<16x1xf32>
    %364 = arith.mulf %355, %355 : vector<16x256xf32>
    %cst_197 = arith.constant dense<0.000000e+00> : vector<16xf32>
    %365 = vector.multi_reduction <add>, %364, %cst_197 [1] : vector<16x256xf32> to vector<16xf32>
    %366 = vector.shape_cast %365 : vector<16xf32> to vector<16x1xf32>
    %cst_198 = arith.constant 3.906250e-03 : f32
    %367 = vector.broadcast %cst_198 : f32 to vector<16x1xf32>
    %368 = arith.mulf %363, %367 : vector<16x1xf32>
    %cst_199 = arith.constant 3.906250e-03 : f32
    %369 = vector.broadcast %cst_199 : f32 to vector<16x1xf32>
    %370 = arith.mulf %366, %369 : vector<16x1xf32>
    %371 = arith.mulf %368, %368 : vector<16x1xf32>
    %372 = arith.subf %370, %371 : vector<16x1xf32>
    %cst_200 = arith.constant 9.99999974E-6 : f32
    %373 = vector.broadcast %cst_200 : f32 to vector<16x1xf32>
    %374 = arith.addf %372, %373 : vector<16x1xf32>
    %375 = math.rsqrt %374 : vector<16x1xf32>
    %376 = arith.mulf %360, %375 : vector<16x1xf32>
    %377 = arith.mulf %368, %376 : vector<16x1xf32>
    %378 = arith.subf %361, %377 : vector<16x1xf32>
    %379 = vector.broadcast %376 : vector<16x1xf32> to vector<16x256xf32>
    %380 = arith.mulf %355, %379 : vector<16x256xf32>
    %381 = vector.broadcast %378 : vector<16x1xf32> to vector<16x256xf32>
    %382 = arith.addf %380, %381 : vector<16x256xf32>
    %cst_201 = arith.constant 0.000000e+00 : f32
    %383 = vector.broadcast %cst_201 : f32 to vector<16x256xf32>
    %384 = arith.maximumf %382, %383 : vector<16x256xf32>
    %c1_i32_202 = arith.constant 1 : i32
    %385 = tpu.dynamic_rotate %384 by %c1_i32_202 dim 1 : vector<16x256xf32>, i32 -> vector<16x256xf32>
    %cst_203 = arith.constant 0.000000e+00 : f32
    %386 = vector.shape_cast %63 : vector<1x256xi1> to vector<1x256xi1>
    %387 = vector.broadcast %386 : vector<1x256xi1> to vector<16x256xi1>
    %388 = vector.broadcast %cst_203 : f32 to vector<16x256xf32>
    %389 = arith.select %387, %385, %388 : vector<16x256xi1>, vector<16x256xf32>
    %c255_i32_204 = arith.constant 255 : i32
    %390 = tpu.dynamic_rotate %384 by %c255_i32_204 dim 1 : vector<16x256xf32>, i32 -> vector<16x256xf32>
    %cst_205 = arith.constant 0.000000e+00 : f32
    %391 = vector.shape_cast %65 : vector<1x256xi1> to vector<1x256xi1>
    %392 = vector.broadcast %391 : vector<1x256xi1> to vector<16x256xi1>
    %393 = vector.broadcast %cst_205 : f32 to vector<16x256xf32>
    %394 = arith.select %392, %390, %393 : vector<16x256xi1>, vector<16x256xf32>
    %c0_206 = arith.constant 0 : index
    %c0_207 = arith.constant 0 : index
    %395 = vector.load %arg31[%c0_206, %c0_207] : memref<96x256xf32, #tpu.memory_space<vmem>>, vector<16x256xf32>
    tpu.vector_store %arg31[%c0_206, %c0_207], %389 {strides = array<i32>} : memref<96x256xf32, #tpu.memory_space<vmem>>, vector<16x256xf32>,
    %c16_208 = arith.constant 16 : index
    %c0_209 = arith.constant 0 : index
    %396 = vector.load %arg31[%c16_208, %c0_209] : memref<96x256xf32, #tpu.memory_space<vmem>>, vector<16x256xf32>
    tpu.vector_store %arg31[%c16_208, %c0_209], %384 {strides = array<i32>} : memref<96x256xf32, #tpu.memory_space<vmem>>, vector<16x256xf32>,
    %c32_210 = arith.constant 32 : index
    %c0_211 = arith.constant 0 : index
    %397 = vector.load %arg31[%c32_210, %c0_211] : memref<96x256xf32, #tpu.memory_space<vmem>>, vector<16x256xf32>
    tpu.vector_store %arg31[%c32_210, %c0_211], %394 {strides = array<i32>} : memref<96x256xf32, #tpu.memory_space<vmem>>, vector<16x256xf32>,
    %c0_212 = arith.constant 0 : index
    %c0_213 = arith.constant 0 : index
    %398 = vector.load %arg31[%c0_212, %c0_213] : memref<96x256xf32, #tpu.memory_space<vmem>>, vector<48x256xf32>
    %399 = arith.truncf %398 : vector<48x256xf32> to vector<48x256xbf16>
    %c0_214 = arith.constant 0 : index
    %c0_215 = arith.constant 0 : index
    %400 = vector.load %arg26[%c0_214, %c0_215] : memref<32x48xbf16, #tpu.memory_space<vmem>>, vector<32x48xbf16>
    %cst_216 = arith.constant dense<0.000000e+00> : vector<32x256xf32>
    %401 = tpu.matmul %400, %399, %cst_216 {dimension_numbers = #tpu.dot_dimension_numbers<[1], [0], [0], [1], [0, 0, 1, 1], [], []>} : vector<32x48xbf16>, vector<48x256xbf16>, vector<32x256xf32> -> vector<32x256xf32>
    %c0_217 = arith.constant 0 : index
    %c0_218 = arith.constant 0 : index
    %402 = vector.load %arg27[%c0_217, %c0_218] : memref<32x1xf32, #tpu.memory_space<vmem>>, vector<32x1xf32>
    %c0_219 = arith.constant 0 : index
    %c0_220 = arith.constant 0 : index
    %403 = vector.load %arg28[%c0_219, %c0_220] : memref<32x1xf32, #tpu.memory_space<vmem>>, vector<32x1xf32>
    %cst_221 = arith.constant dense<0.000000e+00> : vector<32xf32>
    %404 = vector.multi_reduction <add>, %401, %cst_221 [1] : vector<32x256xf32> to vector<32xf32>
    %405 = vector.shape_cast %404 : vector<32xf32> to vector<32x1xf32>
    %406 = arith.mulf %401, %401 : vector<32x256xf32>
    %cst_222 = arith.constant dense<0.000000e+00> : vector<32xf32>
    %407 = vector.multi_reduction <add>, %406, %cst_222 [1] : vector<32x256xf32> to vector<32xf32>
    %408 = vector.shape_cast %407 : vector<32xf32> to vector<32x1xf32>
    %cst_223 = arith.constant 3.906250e-03 : f32
    %409 = vector.broadcast %cst_223 : f32 to vector<32x1xf32>
    %410 = arith.mulf %405, %409 : vector<32x1xf32>
    %cst_224 = arith.constant 3.906250e-03 : f32
    %411 = vector.broadcast %cst_224 : f32 to vector<32x1xf32>
    %412 = arith.mulf %408, %411 : vector<32x1xf32>
    %413 = arith.mulf %410, %410 : vector<32x1xf32>
    %414 = arith.subf %412, %413 : vector<32x1xf32>
    %cst_225 = arith.constant 9.99999974E-6 : f32
    %415 = vector.broadcast %cst_225 : f32 to vector<32x1xf32>
    %416 = arith.addf %414, %415 : vector<32x1xf32>
    %417 = math.rsqrt %416 : vector<32x1xf32>
    %418 = arith.mulf %402, %417 : vector<32x1xf32>
    %419 = arith.mulf %410, %418 : vector<32x1xf32>
    %420 = arith.subf %403, %419 : vector<32x1xf32>
    %421 = vector.broadcast %418 : vector<32x1xf32> to vector<32x256xf32>
    %422 = arith.mulf %401, %421 : vector<32x256xf32>
    %423 = vector.broadcast %420 : vector<32x1xf32> to vector<32x256xf32>
    %424 = arith.addf %422, %423 : vector<32x256xf32>
    %425 = arith.addf %424, %359 : vector<32x256xf32>
    %426 = vector.extract_strided_slice %425 {offsets = [0, 0], sizes = [32, 128], strides = [1, 1]} : vector<32x256xf32> to vector<32x128xf32>
    %c0_226 = arith.constant 0 : index
    %c0_227 = arith.constant 0 : index
    %c0_228 = arith.constant 0 : index
    %427 = vector.load %arg29[%c0_226, %c0_227, %c0_228] : memref<2x32x128xf32, #tpu.memory_space<vmem>>, vector<1x32x128xf32>
    %428 = vector.shape_cast %427 : vector<1x32x128xf32> to vector<32x128xf32>
    %429 = vector.shape_cast %426 : vector<32x128xf32> to vector<1x32x128xf32>
    tpu.vector_store %arg29[%c0_226, %c0_227, %c0_228], %429 {strides = array<i32>} : memref<2x32x128xf32, #tpu.memory_space<vmem>>, vector<1x32x128xf32>,
    %430 = vector.extract_strided_slice %425 {offsets = [0, 128], sizes = [32, 128], strides = [1, 1]} : vector<32x256xf32> to vector<32x128xf32>
    %c1_229 = arith.constant 1 : index
    %c0_230 = arith.constant 0 : index
    %c0_231 = arith.constant 0 : index
    %431 = vector.load %arg29[%c1_229, %c0_230, %c0_231] : memref<2x32x128xf32, #tpu.memory_space<vmem>>, vector<1x32x128xf32>
    %432 = vector.shape_cast %431 : vector<1x32x128xf32> to vector<32x128xf32>
    %433 = vector.shape_cast %430 : vector<32x128xf32> to vector<1x32x128xf32>
    tpu.vector_store %arg29[%c1_229, %c0_230, %c0_231], %433 {strides = array<i32>} : memref<2x32x128xf32, #tpu.memory_space<vmem>>, vector<1x32x128xf32>,
    return
  }
}

</mosaic_0001>

<bundles_post_ra>
// kernel: single_channel_ae_cnn_forward.1
= control target key start
LH: loop header
LB: loop body
LE: loop exit
PB: predicated region body
PF: predicated region fallthrough
CT: control target
= control target key end

     0   :  { %s2637_s6 = smov 1   ;;  %s2638_s10 = smov 2   ;;  %s3409_s0 = inlined_call_operand.smem [shape: u32[31], index: -1, kind: input, shape index: {}] }
   0x1   :  { %s2683_s5 = sld [smem:[%s3409_s0]]   ;;  %s2639_s14 = smov 3  }
   0x2   :  { %s2688_s9 = sld [smem:[%s3409_s0 + %s2637_s6]]   ;;  %s2640_s18 = smov 4  }
   0x3   :  { %s2693_s13 = sld [smem:[%s3409_s0 + %s2638_s10]]   ;;  %s2641_s22 = smov 5  }
   0x4   :  { %s2698_s17 = sld [smem:[%s3409_s0 + %s2639_s14]]   ;;  %s2642_s26 = smov 6  }
   0x5   :  { %s2703_s21 = sld [smem:[%s3409_s0 + %s2640_s18]]   ;;  %s2643_s30 = smov 7  }
   0x6   :  { %s2708_s25 = sld [smem:[%s3409_s0 + %s2641_s22]]   ;;  %s2644_s4 = smov 8  }
   0x7   :  { %s2713_s29 = sld [smem:[%s3409_s0 + %s2642_s26]]   ;;  %s2645_s10 = smov 9  }
   0x8   :  { %s2718_s3 = sld [smem:[%s3409_s0 + %s2643_s30]]   ;;  %s2646_s15 = smov 10  }
   0x9   :  { %s2723_s8 = sld [smem:[%s3409_s0 + %s2644_s4]]   ;;  %s2647_s20 = smov 11  }
   0xa   :  { %s2728_s14 = sld [smem:[%s3409_s0 + %s2645_s10]]   ;;  %s2648_s26 = smov 12  }
   0xb   :  { %s2733_s19 = sld [smem:[%s3409_s0 + %s2646_s15]]   ;;  %s2649_s1 = smov 13  }
   0xc   :  { %s2738_s24 = sld [smem:[%s3409_s0 + %s2647_s20]]   ;;  %s2650_s7 = smov 14  }
   0xd   :  { %s2743_s30 = sld [smem:[%s3409_s0 + %s2648_s26]]   ;;  %s2651_s15 = smov 15  }
   0xe   :  { %s2748_s6 = sld [smem:[%s3409_s0 + %s2649_s1]]   ;;  %s2652_s22 = smov 16  }
   0xf   :  { %s2753_s12 = sld [smem:[%s3409_s0 + %s2650_s7]]   ;;  %s2653_s28 = smov 17  }
  0x10   :  { %s2758_s20 = sld [smem:[%s3409_s0 + %s2651_s15]]   ;;  %s2654_s7 = smov 18  }
  0x11   :  { %s2763_s27 = sld [smem:[%s3409_s0 + %s2652_s22]]   ;;  %s2655_s15 = smov 19  }
  0x12   :  { %s2768_s4 = sld [smem:[%s3409_s0 + %s2653_s28]]   ;;  %s2656_s22 = smov 20  }
  0x13   :  { %s2657_s28 = smov 21  }
  0x15   :  { %3419 = sst [smem:[#allocation9_spill]] %s2753_s12 }
  0x16   :  { %3420 = sst [smem:[#allocation10_spill]] %s2758_s20 }
  0x17   :  { %3421 = sst [smem:[#allocation11_spill]] %s2763_s27 }
  0x18   :  { %3422 = sst [smem:[#allocation12_spill]] %s2768_s4 }
  0x19   :  { %s2773_s12 = sld [smem:[%s3409_s0 + %s2654_s7]]   ;;  %s2658_s7 = smov 22  }
  0x1a   :  { %s2778_s20 = sld [smem:[%s3409_s0 + %s2655_s15]]   ;;  %s2659_s15 = smov 23  }
  0x1b   :  { %s2783_s27 = sld [smem:[%s3409_s0 + %s2656_s22]]   ;;  %s2660_s22 = smov 24  }
  0x1c   :  { %s2788_s4 = sld [smem:[%s3409_s0 + %s2657_s28]]   ;;  %s2661_s28 = smov 25  }
  0x1f   :  { %3423 = sst [smem:[#allocation13_spill]] %s2773_s12 }
  0x20   :  { %3424 = sst [smem:[#allocation14_spill]] %s2778_s20 }
  0x21   :  { %3425 = sst [smem:[#allocation15_spill]] %s2783_s27 }
  0x22   :  { %3426 = sst [smem:[#allocation16_spill]] %s2788_s4 }
  0x23   :  { %s2793_s12 = sld [smem:[%s3409_s0 + %s2658_s7]]   ;;  %s2662_s7 = smov 26  }
  0x24   :  { %s2798_s20 = sld [smem:[%s3409_s0 + %s2659_s15]]   ;;  %s2663_s15 = smov 27  }
  0x25   :  { %s2803_s27 = sld [smem:[%s3409_s0 + %s2660_s22]]   ;;  %s2664_s22 = smov 28  }
  0x26   :  { %s2808_s4 = sld [smem:[%s3409_s0 + %s2661_s28]]   ;;  %s2665_s28 = smov 29  }
  0x29   :  { %3427 = sst [smem:[#allocation17_spill]] %s2793_s12 }
  0x2a   :  { %3428 = sst [smem:[#allocation18_spill]] %s2798_s20 }
  0x2b   :  { %3429 = sst [smem:[#allocation19_spill]] %s2803_s27 }
  0x2c   :  { %3430 = sst [smem:[#allocation20_spill]] %s2808_s4 }
  0x2d   :  { %s2813_s12 = sld [smem:[%s3409_s0 + %s2662_s7]]   ;;  %s2666_s7 = smov 30  }
  0x2e   :  { %s2818_s20 = sld [smem:[%s3409_s0 + %s2663_s15]]  }
  0x2f   :  { %s2823_s27 = sld [smem:[%s3409_s0 + %s2664_s22]]  }
  0x30   :  { %s2828_s4 = sld [smem:[%s3409_s0 + %s2665_s28]]  }
  0x33   :  { %3431 = sst [smem:[#allocation21_spill]] %s2813_s12 }
  0x34   :  { %s2833_s12 = sld [smem:[%s3409_s0 + %s2666_s7]]  }
  0x35   :  { %67 = vsyncpa [#allocation4], 0  ;;  %v2176_v0 = vld [vmem:[%s2683_s5 + $0x20] sm:$0xff]  ;;  %v2177_v2 = vld [vmem:[%s2683_s5 + $0x28] sm:$0xff] }
  0x36   :  { %v128_v1 = vld [vmem:[%s2683_s5] sm:$0xff]  ;;  %187 = vadd.xlane.f32.xlu1 %v2176_v0  ;;  %v129_v3 = vld [vmem:[%s2683_s5 + $0x8] sm:$0xff]  ;;  %v2178_v4 = vld [vmem:[%s2683_s5 + $0x30] sm:$0xff] }
  0x37   :  { %132 = vadd.xlane.f32.xlu0 %v128_v1  ;;  %v130_v5 = vld [vmem:[%s2683_s5 + $0x10] sm:$0xff]  ;;  %v2179_v6 = vld [vmem:[%s2683_s5 + $0x38] sm:$0xff] }
  0x38   :  { %v131_v7 = vld [vmem:[%s2683_s5 + $0x18] sm:$0xff] }
  0x3a   :  { %189 = vadd.xlane.f32.xlu1 %v2177_v2 }
  0x3b   :  { %134 = vadd.xlane.f32.xlu0 %v129_v3 }
  0x3e   :  { %191 = vadd.xlane.f32.xlu1 %v2178_v4 }
  0x3f   :  { %136 = vadd.xlane.f32.xlu0 %v130_v5 }
  0x40   :  { %68 = vsyncpa [#allocation6], 0  ;;  %s2667_s0 = smov 127   ;;  %s2668_s5 = smov 1   ;;  %vm423_vm10 = vcmask 785408   ;;  %vm972_vm11 = vcmask 392192  }
  0x41   :  { %vm1303_vm12 = vcmask 1043456   ;;  %vm2670_vm13 = vmmov 1   ;;  %s2671_s15 = smov [#allocation5]  }
  0x42   :  { %193 = vadd.xlane.f32.xlu1 %v2179_v6  ;;  %s2131_s16 = sshll.u32 %s2671_s15, 4  ;;  %s2132_s16 = int_to_ptr.vmem [resolvable:$true] %s2131_s16 }
  0x43   :  { %138 = vadd.xlane.f32.xlu0 %v131_v7  ;;  %s2593_s18 = scalar_lea.vmem %s2132_s16, 256  ;;  %p2598_p1 = scmp.lt.s32.totalorder %s2132_s16, %s2132_s16 }
  0x44   :  { %p2594_p0 = scmp.ne.s32.totalorder %s2132_s16, %s2593_s18  ;;  %p2599_p2 = scmp.lt.s32.totalorder %s2593_s18, %s2593_s18 }
  0x46   :  { %p2600_p3 = por %p2599_p2, %p2598_p1 }
  0x48   :  { %p2601_p4 = pnand %p2600_p3, %p2594_p0 }
  0xbf   :  { %v188_v8 = vpop.xlane.xlu1 %187 }
  0xc0   :  { %v133_v9 = vpop.xlane.xlu0 %132 }
  0xc3   :  { %v190_v10 = vpop.xlane.xlu1 %189 }
  0xc4   :  { %v135_v11 = vpop.xlane.xlu0 %134  ;;  %v195_v14 = vadd.f32 %v190_v10, %v188_v8 }
  0xc5   :  { %v140_v15 = vadd.f32 %v135_v11, %v133_v9 }
  0xc7   :  { %v192_v12 = vpop.xlane.xlu1 %191 }
  0xc8   :  { %v137_v13 = vpop.xlane.xlu0 %136  ;;  %v196_v16 = vadd.f32 %v195_v14, %v192_v12 }
  0xc9   :  { %v141_v17 = vadd.f32 %v140_v15, %v137_v13 }
  0xcb   :  { %v194_v18 = vpop.xlane.xlu1 %193 }
  0xcc   :  { %v139_v19 = vpop.xlane.xlu0 %138  ;;  %v197_v20 = vadd.f32 %v196_v16, %v194_v18 }
  0xcd   :  { %v142_v21 = vadd.f32 %v141_v17, %v139_v19 }
  0xce   :  { %v198_v22 = vrot.slane %v197_v20, 4 }
  0xcf   :  { %v143_v23 = vrot.slane %v142_v21, 4 }
  0xd0   :  { %v199_v24 = vadd.f32 %v198_v22, %v197_v20 }
  0xd1   :  { %v144_v25 = vadd.f32 %v143_v23, %v142_v21 }
  0xd2   :  { %v200_v26 = vrot.slane %v199_v24, 2 }
  0xd3   :  { %v145_v27 = vrot.slane %v144_v25, 2 }
  0xd4   :  { %v201_v28 = vadd.f32 %v200_v26, %v199_v24 }
  0xd5   :  { %v146_v29 = vadd.f32 %v145_v27, %v144_v25 }
  0xd6   :  { %v202_v30 = vrot.slane %v201_v28, 1 }
  0xd7   :  { %v147_v31 = vrot.slane %v146_v29, 1 }
  0xd8   :  { %v203_v32 = vadd.f32 %v202_v30, %v201_v28 }
  0xd9   :  { %v148_v33 = vadd.f32 %v147_v31, %v146_v29 }
  0xda   :  { %v204_v34 = vmul.f32 0.00024414063, %v203_v32 }
  0xdb   :  { %v149_v35 = vmul.f32 0.00024414063, %v148_v33 }
  0xdc   :  { %v206_v40 = vsub.f32 %v2177_v2, %v204_v34  ;;  %v205_v41 = vsub.f32 %v2176_v0, %v204_v34  ;;  %v207_v44 = vsub.f32 %v2178_v4, %v204_v34  ;;  %v208_v48 = vsub.f32 %v2179_v6, %v204_v34 }
  0xdd   :  { %v2843_v36 = vsub.f32 %v129_v3, %v149_v35  ;;  %v2845_v37 = vsub.f32 %v128_v1, %v149_v35  ;;  %v152_v45 = vsub.f32 %v130_v5, %v149_v35  ;;  %v153_v49 = vsub.f32 %v131_v7, %v149_v35 }
  0xde   :  { %v210_v42 = vmul.f32 %v206_v40, %v206_v40  ;;  %v209_v43 = vmul.f32 %v205_v41, %v205_v41  ;;  %v211_v46 = vmul.f32 %v207_v44, %v207_v44  ;;  %v212_v50 = vmul.f32 %v208_v48, %v208_v48 }
  0xdf   :  { %v155_v38 = vmul.f32 %v2843_v36, %v2843_v36  ;;  %v154_v39 = vmul.f32 %v2845_v37, %v2845_v37  ;;  %v156_v47 = vmul.f32 %v152_v45, %v152_v45  ;;  %v157_v51 = vmul.f32 %v153_v49, %v153_v49 }
  0xe1   :  { %160 = vadd.xlane.f32.xlu1 %v155_v38  ;;  %158 = vadd.xlane.f32.xlu0 %v154_v39 }
  0xe5   :  { %215 = vadd.xlane.f32.xlu1 %v210_v42  ;;  %213 = vadd.xlane.f32.xlu0 %v209_v43 }
  0xe9   :  { %217 = vadd.xlane.f32.xlu1 %v211_v46  ;;  %162 = vadd.xlane.f32.xlu0 %v156_v47 }
  0xed   :  { %219 = vadd.xlane.f32.xlu1 %v212_v50  ;;  %164 = vadd.xlane.f32.xlu0 %v157_v51 }
 0x16a   :  { %v161_v52 = vpop.xlane.xlu1 %160  ;;  %v159_v53 = vpop.xlane.xlu0 %158 }
 0x16b   :  { %v166_v58 = vadd.f32 %v161_v52, %v159_v53 }
 0x16e   :  { %v216_v54 = vpop.xlane.xlu1 %215  ;;  %v214_v55 = vpop.xlane.xlu0 %213 }
 0x16f   :  { %v221_v59 = vadd.f32 %v216_v54, %v214_v55 }
 0x172   :  { %v218_v56 = vpop.xlane.xlu1 %217  ;;  %v163_v57 = vpop.xlane.xlu0 %162 }
 0x173   :  { %v222_v60 = vadd.f32 %v221_v59, %v218_v56  ;;  %v167_v61 = vadd.f32 %v166_v58, %v163_v57 }
 0x176   :  { %v220_v62 = vpop.xlane.xlu1 %219  ;;  %v165_v63 = vpop.xlane.xlu0 %164 }
 0x177   :  { %v223_v0 = vadd.f32 %v222_v60, %v220_v62  ;;  %v168_v1 = vadd.f32 %v167_v61, %v165_v63 }
 0x179   :  { %v224_v2 = vrot.slane %v223_v0, 4  ;;  %v169_v3 = vrot.slane %v168_v1, 4 }
 0x17b   :  { %v225_v4 = vadd.f32 %v224_v2, %v223_v0  ;;  %v170_v5 = vadd.f32 %v169_v3, %v168_v1 }
 0x17d   :  { %v226_v6 = vrot.slane %v225_v4, 2  ;;  %v171_v7 = vrot.slane %v170_v5, 2 }
 0x17f   :  { %v227_v8 = vadd.f32 %v226_v6, %v225_v4  ;;  %v172_v9 = vadd.f32 %v171_v7, %v170_v5 }
 0x181   :  { %v228_v10 = vrot.slane %v227_v8, 1  ;;  %v173_v11 = vrot.slane %v172_v9, 1 }
 0x183   :  { %v229_v12 = vadd.f32 %v228_v10, %v227_v8  ;;  %v174_v13 = vadd.f32 %v173_v11, %v172_v9 }
 0x185   :  { %v230_v14 = vmul.f32 0.00024420026, %v229_v12  ;;  %v175_v15 = vmul.f32 0.00024420026, %v174_v13 }
 0x187   :  { %v231_v16 = vadd.f32 1e-06, %v230_v14  ;;  %v176_v17 = vadd.f32 1e-06, %v175_v15 }
 0x189   :  { %2553 = vrsqrt.f32 %v231_v16 }
 0x18a   :  { %2555 = vrsqrt.f32 %v176_v17 }
 0x196   :  { %v2554_v18 = vpop.eup %2553 }
 0x197   :  { %v2556_v19 = vpop.eup %2555  ;;  %v2851_v20 = vmul.f32 %v2554_v18, %v207_v44  ;;  %v2853_v21 = vmul.f32 %v2554_v18, %v208_v48  ;;  %v2855_v22 = vmul.f32 %v2554_v18, %v205_v41  ;;  %v2857_v23 = vmul.f32 %v2554_v18, %v206_v40 }
 0x198   :  { %v2859_v24 = vmul.f32 %v2556_v19, %v152_v45  ;;  %v2861_v25 = vmul.f32 %v2556_v19, %v153_v49  ;;  %v2864_v26 = vmul.f32 %v2556_v19, %v2845_v37  ;;  %v2867_v27 = vmul.f32 %v2556_v19, %v2843_v36 }
 0x199   :  { %v2362_v28 = vpack.i.bf16 %v2853_v21, %v2851_v20  ;;  %v397_v30 = vpack.c.bf16 %v2853_v21, %v2851_v20  ;;  %v395_v32 = vpack.c.bf16 %v2857_v23, %v2855_v22  ;;  %v2372_v35 = vpack.i.bf16 %v2857_v23, %v2855_v22 }
 0x19a   :  { %v2357_v29 = vpack.i.bf16 %v2861_v25, %v2859_v24  ;;  %v396_v31 = vpack.c.bf16 %v2861_v25, %v2859_v24  ;;  %v394_v33 = vpack.c.bf16 %v2867_v27, %v2864_v26  ;;  %v2367_v34 = vpack.i.bf16 %v2867_v27, %v2864_v26 }
 0x19b   :  { %2363 = vrot.lane.b32.xlu1 %v2362_v28, %s2667_s0  ;;  %v2669_v36 = vmov 0   ;;  %v237_v37 = vlaneseq }
 0x19c   :  { %2358 = vrot.lane.b32.xlu0 %v2357_v29, %s2667_s0  ;;  %465 = vmatprep.mubr.bf16.mxu0 %v2669_v36 }
 0x19d   :  { %2397 = vset.pattern.permute.xlu0 %v2669_v36  ;;  %2398 = vset.pattern.permute.xlu1 %v2669_v36  ;;  %v2897_v38 = vand.u32 127, %v237_v37 }
 0x19e   :  { %818 = vmatprep.mubr.bf16.mxu1 %v2669_v36 }
 0x19f   :  { %2368 = vrot.lane.b32.xlu1 %v2367_v34, %s2667_s0  ;;  %v239_v39 = vadd.s32 128, %v2897_v38  ;;  %vm321_vm1 = vcmp.lt.s32.totalorder %v2897_v38, 127  ;;  %vm266_vm2 = vcmp.ne.s32.totalorder %v2897_v38, 127  ;;  %vm284_vm5 = vcmp.lt.s32.totalorder %v2897_v38, 1 }
 0x1a0   :  { %2378 = vrot.lane.b32.xlu0 %v2357_v29, %s2668_s5  ;;  %vm2924_vm4 = vmpackc.low %vm266_vm2, %vm266_vm2  ;;  %vm264_vm8 = vcmp.ne.s32.totalorder %v2897_v38, 0 }
 0x1a1   :  { %v251_v40 = vand.u32 127, %v239_v39  ;;  %vm2983_vm9 = vmpackc.low %vm264_vm8, %vm264_vm8 }
 0x1a2   :  { %vm3225_vm15 = vmpackc.low %vm2670_vm13, %vm264_vm8 }
 0x1a3   :  { %2373 = vrot.lane.b32.xlu1 %v2372_v35, %s2667_s0  ;;  %vm2900_vm0 = vcmp.ne.s32.totalorder %v251_v40, 127  ;;  %vm2945_vm6 = vcmp.ne.s32.totalorder %v251_v40, 0 }
 0x1a4   :  { %2388 = vrot.lane.b32.xlu0 %v2367_v34, %s2668_s5  ;;  %vm2913_vm3 = vmpackc.low %vm2900_vm0, %vm2900_vm0 }
 0x1a5   :  { %vm2962_vm7 = vmpackc.low %vm2945_vm6, %vm2945_vm6 }
 0x1a6   :  { %vm3213_vm14 = vmpackc.low %vm2670_vm13, %vm2945_vm6  ;;  %vm1296_vm6 = vcmask 195584  }
 0x1a7   :  { %2383 = vrot.lane.b32.xlu1 %v2362_v28, %s2668_s5 }
 0x1ab   :  { %2393 = vrot.lane.b32.xlu1 %v2372_v35, %s2668_s5 }
 0x20d   :  { %v2364_v41 = vpop.permute.xlu1 %2363 }
 0x20e   :  { %v2366_v42 = vunpack.i.h.bf16 %v2364_v41  ;;  %v2365_v43 = vunpack.i.l.bf16 %v2364_v41  ;;  %v2359_v44 = vpop.permute.xlu0 %2358 }
 0x20f   :  { %v2361_v46 = vunpack.i.h.bf16 %v2359_v44  ;;  %v2360_v47 = vunpack.i.l.bf16 %v2359_v44 }
 0x211   :  { %v2369_v48 = vpop.permute.xlu1 %2368  ;;  %v328_v49 = vsel %vm321_vm1, %v2365_v43, %v2360_v47  ;;  %v329_v50 = vsel %vm321_vm1, %v2366_v42, %v2361_v46  ;;  %v324_v52 = vsel %vm321_vm1, %v2360_v47, %v2365_v43  ;;  %v325_v53 = vsel %vm321_vm1, %v2361_v46, %v2366_v42 }
 0x212   :  { %v2212_v54 = vpack.c.bf16 %v329_v50, %v328_v49  ;;  %v2215_v56 = vpack.c.bf16 %v325_v53, %v324_v52  ;;  %v2371_v58 = vunpack.i.h.bf16 %v2369_v48  ;;  %v2370_v59 = vunpack.i.l.bf16 %v2369_v48  ;;  %v2379_v2 = vpop.permute.xlu0 %2378 }
 0x213   :  { %v2381_v9 = vunpack.i.h.bf16 %v2379_v2  ;;  %v2380_v10 = vunpack.i.l.bf16 %v2379_v2 }
 0x214   :  { %2213 = vmatprep.subr.msk.bf16.mxu0 %vm2913_vm3, %v2212_v54 }
 0x215   :  { %2216 = vmatpush1.bf16.msk.msra.mxu0 %vm2924_vm4, %v2215_v56  ;;  %v2374_v57 = vpop.permute.xlu1 %2373 }
 0x216   :  { %v2376_v60 = vunpack.i.h.bf16 %v2374_v57  ;;  %v2375_v61 = vunpack.i.l.bf16 %v2374_v57  ;;  %v2389_v11 = vpop.permute.xlu0 %2388 }
 0x217   :  { %v2391_v17 = vunpack.i.h.bf16 %v2389_v11  ;;  %v2390_v18 = vunpack.i.l.bf16 %v2389_v11 }
 0x218   :  { %v322_v62 = vsel %vm321_vm1, %v2370_v59, %v2375_v61  ;;  %v323_v63 = vsel %vm321_vm1, %v2371_v58, %v2376_v60  ;;  %v326_v0 = vsel %vm321_vm1, %v2375_v61, %v2370_v59  ;;  %v327_v1 = vsel %vm321_vm1, %v2376_v60, %v2371_v58 }
 0x219   :  { %v2384_v3 = vpop.permute.xlu1 %2383  ;;  %v2218_v4 = vpack.c.bf16 %v327_v1, %v326_v0  ;;  %v2221_v5 = vpack.c.bf16 %v323_v63, %v322_v62 }
 0x21a   :  { %v2386_v6 = vunpack.i.h.bf16 %v2384_v3  ;;  %v2385_v7 = vunpack.i.l.bf16 %v2384_v3 }
 0x21b   :  { %2219 = vmatprep.subr.msk.bf16.mxu0 %vm2913_vm3, %v2218_v4 }
 0x21c   :  { %2222 = vmatpush1.bf16.msk.msra.mxu0 %vm2924_vm4, %v2221_v5  ;;  %v288_v13 = vsel %vm284_vm5, %v2381_v9, %v2386_v6  ;;  %v287_v14 = vsel %vm284_vm5, %v2380_v10, %v2385_v7  ;;  %v292_v20 = vsel %vm284_vm5, %v2386_v6, %v2381_v9  ;;  %v291_v21 = vsel %vm284_vm5, %v2385_v7, %v2380_v10 }
 0x21d   :  { %v2394_v8 = vpop.permute.xlu1 %2393  ;;  %441 = vmatprep.subr.bf16.mxu0 %v397_v30  ;;  %v2224_v22 = vpack.c.bf16 %v288_v13, %v287_v14  ;;  %v2227_v28 = vpack.c.bf16 %v292_v20, %v291_v21 }
 0x21e   :  { %v2396_v15 = vunpack.i.h.bf16 %v2394_v8  ;;  %v2395_v16 = vunpack.i.l.bf16 %v2394_v8 }
 0x220   :  { %442 = vmatpush1.bf16.msra.mxu0 %v396_v31  ;;  %v286_v23 = vsel %vm284_vm5, %v2391_v17, %v2396_v15  ;;  %v285_v24 = vsel %vm284_vm5, %v2390_v18, %v2395_v16  ;;  %v290_v29 = vsel %vm284_vm5, %v2396_v15, %v2391_v17  ;;  %v289_v30 = vsel %vm284_vm5, %v2395_v16, %v2390_v18  ;;  %v2539_v31 = vld [vmem:[%s2688_s9] sm:$0xff]  }
 0x221   :  { %443 = vmatprep.subr.bf16.mxu0 %v395_v32  ;;  %v2230_v26 = vpack.c.bf16 %v286_v23, %v285_v24  ;;  %v2233_v27 = vpack.c.bf16 %v290_v29, %v289_v30  ;;  %v2540_v32 = vld [vmem:[%s2688_s9 + $0x8] sm:$0xff]   ;;  %v514_v30 = vld [vmem:[%s2693_s13 + $0x10] sm:$0xff] }
 0x224   :  { %444 = vmatpush1.bf16.msra.mxu0 %v394_v33 }
 0x225   :  { %2225 = vmatprep.subr.msk.bf16.mxu0 %vm2962_vm7, %v2224_v22 }
 0x228   :  { %2228 = vmatpush1.bf16.msk.msra.mxu0 %vm2983_vm9, %v2227_v28 }
 0x229   :  { %2231 = vmatprep.subr.msk.bf16.mxu0 %vm2962_vm7, %v2230_v26 }
 0x22c   :  { %2234 = vmatpush1.bf16.msk.msra.mxu0 %vm2983_vm9, %v2233_v27 }
 0x22f   :  { %2183 = vmatmul.mubr.msk.bf16.vlgmr.msra.gmra.mxu0 %vm423_vm10, %v2539_v31 }
 0x230   :  { %475 = vmatprep.mubr.bf16.mxu0 %v2669_v36 }
 0x237   :  { %2184 = vmatmul.mubr.msk.bf16.gmra.mxu0 %vm423_vm10, %v2540_v32  ;;  %v512_v32 = vld [vmem:[%s2693_s13] sm:$0xff] }
 0x238   :  { %485 = vmatprep.mubr.bf16.mxu0 %v2669_v36 }
 0x2ef   :  { %v3003_v33 = vpop.f32.mrf.mxu0 }
 0x2f0   :  { %v532_v58 = vmul.f32 %v3003_v33, %v3003_v33 }
 0x2f1   :  { %v3005_v34 = vpop.f32.mrf.mxu0 }
 0x2f2   :  { %v520_v35 = vadd.f32 %v3005_v34, %v3003_v33  ;;  %v533_v56 = vmul.f32 %v3005_v34, %v3005_v34 }
 0x2f3   :  { %v3009_v37 = vpop.f32.mrf.mxu0 }
 0x2f4   :  { %521 = vadd.xlane.f32.xlu0 %v520_v35  ;;  %v534_v59 = vmul.f32 %v3009_v37, %v3009_v37  ;;  %v540_v60 = vadd.f32 %v533_v56, %v532_v58  ;;  %v518_v58 = vld [vmem:[%s2698_s17 + $0x10] sm:$0xff] }
 0x2f5   :  { %v3011_v39 = vpop.f32.mrf.mxu0 }
 0x2f6   :  { %v523_v54 = vadd.f32 %v3011_v39, %v3009_v37  ;;  %v535_v57 = vmul.f32 %v3011_v39, %v3011_v39 }
 0x2f7   :  { %v3013_v40 = vpop.f32.mrf.mxu0 }
 0x2f8   :  { %v536_v46 = vmul.f32 %v3013_v40, %v3013_v40  ;;  %v543_v61 = vadd.f32 %v535_v57, %v534_v59 }
 0x2f9   :  { %v3015_v41 = vpop.f32.mrf.mxu0 }
 0x2fa   :  { %v526_v42 = vadd.f32 %v3015_v41, %v3013_v40  ;;  %v537_v43 = vmul.f32 %v3015_v41, %v3015_v41 }
 0x2fb   :  { %v3021_v44 = vpop.f32.mrf.mxu0 }
 0x2fc   :  { %527 = vadd.xlane.f32.xlu0 %v526_v42  ;;  %v546_v48 = vadd.f32 %v537_v43, %v536_v46  ;;  %v538_v52 = vmul.f32 %v3021_v44, %v3021_v44  ;;  %v513_v46 = vld [vmem:[%s2693_s13 + $0x8] sm:$0xff] }
 0x2fd   :  { %v3025_v47 = vpop.f32.mrf.mxu0 }
 0x2fe   :  { %v529_v49 = vadd.f32 %v3025_v47, %v3021_v44  ;;  %v539_v50 = vmul.f32 %v3025_v47, %v3025_v47 }
 0x300   :  { %547 = vadd.xlane.f32.xlu0 %v546_v48  ;;  %530 = vadd.xlane.f32.xlu1 %v529_v49  ;;  %v549_v53 = vadd.f32 %v539_v50, %v538_v52  ;;  %v516_v50 = vld [vmem:[%s2698_s17] sm:$0xff] }
 0x304   :  { %550 = vadd.xlane.f32.xlu0 %v549_v53  ;;  %524 = vadd.xlane.f32.xlu1 %v523_v54  ;;  %v515_v54 = vld [vmem:[%s2693_s13 + $0x18] sm:$0xff]  ;;  %s3445_s13 = sld [smem:[#allocation10_spill]] }
 0x308   :  { %541 = vadd.xlane.f32.xlu0 %v540_v60  ;;  %544 = vadd.xlane.f32.xlu1 %v543_v61  ;;  %v519_v61 = vld [vmem:[%s2698_s17 + $0x18] sm:$0xff] }
 0x37d   :  { %v522_v62 = vpop.xlane.xlu0 %521 }
 0x37e   :  { %v552_v8 = vmul.f32 0.00390625, %v522_v62 }
 0x380   :  { %v560_v14 = vmul.f32 %v552_v8, %v552_v8 }
 0x385   :  { %v528_v63 = vpop.xlane.xlu0 %527 }
 0x386   :  { %v554_v0 = vmul.f32 0.00390625, %v528_v63 }
 0x388   :  { %v562_v3 = vmul.f32 %v554_v0, %v554_v0 }
 0x389   :  { %v548_v1 = vpop.xlane.xlu0 %547  ;;  %v531_v2 = vpop.xlane.xlu1 %530 }
 0x38a   :  { %v558_v4 = vmul.f32 0.00390625, %v548_v1  ;;  %v555_v18 = vmul.f32 0.00390625, %v531_v2  ;;  %v517_v1 = vld [vmem:[%s2698_s17 + $0x8] sm:$0xff]  ;;  %s3450_s17 = sld [smem:[#allocation11_spill]] }
 0x38c   :  { %v566_v5 = vsub.f32 %v558_v4, %v562_v3  ;;  %v563_v28 = vmul.f32 %v555_v18, %v555_v18 }
 0x38d   :  { %v551_v6 = vpop.xlane.xlu0 %550  ;;  %v525_v7 = vpop.xlane.xlu1 %524 }
 0x38e   :  { %v570_v9 = vadd.f32 1e-05, %v566_v5  ;;  %v553_v10 = vmul.f32 0.00390625, %v525_v7  ;;  %v559_v22 = vmul.f32 0.00390625, %v551_v6 }
 0x390   :  { %2557 = vrsqrt.f32 %v570_v9  ;;  %v561_v15 = vmul.f32 %v553_v10, %v553_v10  ;;  %v567_v29 = vsub.f32 %v559_v22, %v563_v28 }
 0x391   :  { %v542_v11 = vpop.xlane.xlu0 %541  ;;  %v545_v13 = vpop.xlane.xlu1 %544 }
 0x392   :  { %v556_v16 = vmul.f32 0.00390625, %v542_v11  ;;  %v557_v17 = vmul.f32 0.00390625, %v545_v13  ;;  %v571_v27 = vadd.f32 1e-05, %v567_v29 }
 0x394   :  { %v564_v20 = vsub.f32 %v556_v16, %v560_v14  ;;  %v565_v21 = vsub.f32 %v557_v17, %v561_v15 }
 0x396   :  { %v568_v23 = vadd.f32 1e-05, %v564_v20  ;;  %v569_v24 = vadd.f32 1e-05, %v565_v21 }
 0x398   :  { %2559 = vrsqrt.f32 %v568_v23 }
 0x399   :  { %2561 = vrsqrt.f32 %v569_v24 }
 0x39a   :  { %2563 = vrsqrt.f32 %v571_v27 }
 0x39d   :  { %v2558_v26 = vpop.eup %2557 }
 0x39e   :  { %v578_v31 = vmul.f32 %v2558_v26, %v514_v30 }
 0x3a0   :  { %600 = vperm.xlu0 %2397, %v578_v31   ;;  %v582_v57 = vmul.f32 %v578_v31, %v554_v0 }
 0x3a2   :  { %v586_v59 = vsub.f32 %v518_v58, %v582_v57 }
 0x3a5   :  { %v2560_v35 = vpop.eup %2559 }
 0x3a6   :  { %v576_v42 = vmul.f32 %v2560_v35, %v512_v32  ;;  %v2562_v43 = vpop.eup %2561 }
 0x3a7   :  { %v577_v48 = vmul.f32 %v2562_v43, %v513_v46  ;;  %v2564_v53 = vpop.eup %2563 }
 0x3a8   :  { %590 = vperm.xlu1 %2398, %v576_v42   ;;  %v580_v49 = vmul.f32 %v576_v42, %v552_v8  ;;  %v579_v56 = vmul.f32 %v2564_v53, %v515_v54 }
 0x3a9   :  { %v581_v63 = vmul.f32 %v577_v48, %v553_v10 }
 0x3aa   :  { %v584_v52 = vsub.f32 %v516_v50, %v580_v49  ;;  %v583_v60 = vmul.f32 %v579_v56, %v555_v18 }
 0x3ab   :  { %v585_v2 = vsub.f32 %v517_v1, %v581_v63 }
 0x3ac   :  { %595 = vperm.xlu1 %2398, %v577_v48   ;;  %v587_v62 = vsub.f32 %v519_v61, %v583_v60  ;;  %v2542_v48 = vld [vmem:[%s2688_s9 + $0x10] sm:$0xff]   ;;  %s3444_s9 = sld [smem:[#allocation9_spill]] }
 0x3ad   :  { %2185 = vmatmul.mubr.msk.bf16.gmra.mxu0 %vm423_vm10, %v2542_v48 }
 0x3ae   :  { %1206 = vmatprep.mubr.bf16.mxu0 %v2669_v36 }
 0x3b0   :  { %618 = vperm.xlu1 %2398, %v584_v52  }
 0x3b4   :  { %605 = vperm.xlu1 %2398, %v579_v56  }
 0x3b8   :  { %628 = vperm.xlu1 %2398, %v586_v59  }
 0x3bc   :  { %633 = vperm.xlu1 %2398, %v587_v62  }
 0x3c0   :  { %623 = vperm.xlu1 %2398, %v585_v2  }
 0x41b   :  { %v601_v7 = vpop.permute.xlu0 %600 }
 0x41c   :  { %v612_v0 = vmul.f32 %v601_v7, %v3013_v40  ;;  %v613_v9 = vmul.f32 %v601_v7, %v3015_v41 }
 0x423   :  { %v591_v3 = vpop.permute.xlu1 %590 }
 0x424   :  { %v608_v15 = vmul.f32 %v591_v3, %v3003_v33  ;;  %v609_v16 = vmul.f32 %v591_v3, %v3005_v34 }
 0x427   :  { %v596_v4 = vpop.permute.xlu1 %595 }
 0x428   :  { %v610_v21 = vmul.f32 %v596_v4, %v3009_v37  ;;  %v611_v22 = vmul.f32 %v596_v4, %v3011_v39 }
 0x42b   :  { %v619_v5 = vpop.permute.xlu1 %618 }
 0x42c   :  { %v636_v40 = vadd.f32 %v619_v5, %v608_v15  ;;  %v637_v23 = vadd.f32 %v619_v5, %v609_v16 }
 0x42e   :  { %v644_v31 = vmax.f32 %v636_v40, 0.0  ;;  %v645_v32 = vmax.f32 %v637_v23, 0.0 }
 0x42f   :  { %v606_v6 = vpop.permute.xlu1 %605 }
 0x430   :  { %v614_v11 = vmul.f32 %v606_v6, %v3021_v44  ;;  %v615_v13 = vmul.f32 %v606_v6, %v3025_v47 }
 0x433   :  { %v629_v8 = vpop.permute.xlu1 %628 }
 0x434   :  { %v640_v14 = vadd.f32 %v629_v8, %v612_v0  ;;  %v641_v10 = vadd.f32 %v629_v8, %v613_v9 }
 0x436   :  { %v648_v41 = vmax.f32 %v640_v14, 0.0  ;;  %v649_v24 = vmax.f32 %v641_v10, 0.0 }
 0x437   :  { %v634_v17 = vpop.permute.xlu1 %633 }
 0x438   :  { %v642_v18 = vadd.f32 %v634_v17, %v614_v11  ;;  %v643_v20 = vadd.f32 %v634_v17, %v615_v13 }
 0x43a   :  { %v650_v44 = vmax.f32 %v642_v18, 0.0  ;;  %v651_v28 = vmax.f32 %v643_v20, 0.0 }
 0x43b   :  { %v624_v47 = vpop.permute.xlu1 %623 }
 0x43c   :  { %v638_v29 = vadd.f32 %v624_v47, %v610_v21  ;;  %v639_v30 = vadd.f32 %v624_v47, %v611_v22  ;;  %v2409_v26 = vpack.i.bf16 %v651_v28, %v649_v24  ;;  %v2399_v33 = vpack.i.bf16 %v650_v44, %v648_v41 }
 0x43d   :  { %v771_v27 = vpack.c.bf16 %v651_v28, %v649_v24  ;;  %v770_v34 = vpack.c.bf16 %v650_v44, %v648_v41 }
 0x43e   :  { %v646_v35 = vmax.f32 %v638_v29, 0.0  ;;  %v647_v37 = vmax.f32 %v639_v30, 0.0  ;;  %2410 = vrot.lane.b32.xlu0 %v2409_v26, %s2667_s0  ;;  %2400 = vrot.lane.b32.xlu1 %v2399_v33, %s2667_s0 }
 0x440   :  { %v2414_v39 = vpack.i.bf16 %v647_v37, %v645_v32  ;;  %v2404_v42 = vpack.i.bf16 %v646_v35, %v644_v31  ;;  %v769_v43 = vpack.c.bf16 %v647_v37, %v645_v32  ;;  %v768_v46 = vpack.c.bf16 %v646_v35, %v644_v31  ;;  %v2541_v32 = vld [vmem:[%s2708_s25] sm:$0xff]   ;;  %s3452_s25 = sld [smem:[#allocation14_spill]] }
 0x442   :  { %2415 = vrot.lane.b32.xlu0 %v2414_v39, %s2667_s0  ;;  %2405 = vrot.lane.b32.xlu1 %v2404_v42, %s2667_s0 }
 0x446   :  { %2430 = vrot.lane.b32.xlu0 %v2409_v26, %s2668_s5  ;;  %2420 = vrot.lane.b32.xlu1 %v2399_v33, %s2668_s5  ;;  %v2546_v45 = vld [vmem:[%s3452_s25] sm:$0xff]  }
 0x44a   :  { %2435 = vrot.lane.b32.xlu0 %v2414_v39, %s2668_s5  ;;  %2425 = vrot.lane.b32.xlu1 %v2404_v42, %s2668_s5 }
 0x4b0   :  { %v2411_v49 = vpop.permute.xlu0 %2410  ;;  %v2401_v50 = vpop.permute.xlu1 %2400 }
 0x4b1   :  { %v2413_v52 = vunpack.i.h.bf16 %v2411_v49  ;;  %v2412_v53 = vunpack.i.l.bf16 %v2411_v49  ;;  %v2403_v54 = vunpack.i.h.bf16 %v2401_v50  ;;  %v2402_v56 = vunpack.i.l.bf16 %v2401_v50 }
 0x4b3   :  { %v706_v57 = vsel %vm321_vm1, %v2412_v53, %v2402_v56  ;;  %v707_v58 = vsel %vm321_vm1, %v2413_v52, %v2403_v54  ;;  %v702_v59 = vsel %vm321_vm1, %v2402_v56, %v2412_v53  ;;  %v703_v60 = vsel %vm321_vm1, %v2403_v54, %v2413_v52  ;;  %v496_v56 = vld [vmem:[%s2703_s21] sm:$0xff] }
 0x4b4   :  { %v2416_v61 = vpop.permute.xlu0 %2415  ;;  %v2406_v62 = vpop.permute.xlu1 %2405  ;;  %v2236_v63 = vpack.c.bf16 %v707_v58, %v706_v57  ;;  %v2239_v1 = vpack.c.bf16 %v703_v60, %v702_v59  ;;  %v497_v57 = vld [vmem:[%s2703_s21 + $0x8] sm:$0xff]  ;;  %s3451_s21 = sld [smem:[#allocation12_spill]] }
 0x4b5   :  { %v2418_v2 = vunpack.i.h.bf16 %v2416_v61  ;;  %v2417_v3 = vunpack.i.l.bf16 %v2416_v61  ;;  %v2408_v4 = vunpack.i.h.bf16 %v2406_v62  ;;  %v2407_v5 = vunpack.i.l.bf16 %v2406_v62 }
 0x4b6   :  { %2237 = vmatprep.subr.msk.bf16.mxu1 %vm2913_vm3, %v2236_v63 }
 0x4b7   :  { %v701_v6 = vsel %vm321_vm1, %v2408_v4, %v2418_v2  ;;  %v705_v7 = vsel %vm321_vm1, %v2418_v2, %v2408_v4  ;;  %v700_v8 = vsel %vm321_vm1, %v2407_v5, %v2417_v3  ;;  %v704_v0 = vsel %vm321_vm1, %v2417_v3, %v2407_v5  ;;  %2240 = vmatpush1.bf16.msk.msra.mxu1 %vm2924_vm4, %v2239_v1 }
 0x4b8   :  { %v2242_v9 = vpack.c.bf16 %v705_v7, %v704_v0  ;;  %v2245_v11 = vpack.c.bf16 %v701_v6, %v700_v8  ;;  %v2431_v13 = vpop.permute.xlu0 %2430  ;;  %v2421_v14 = vpop.permute.xlu1 %2420  ;;  %v830_v0 = vld [vmem:[%s2713_s29 + $0x8] sm:$0xff] }
 0x4b9   :  { %v2433_v10 = vunpack.i.h.bf16 %v2431_v13  ;;  %v2432_v15 = vunpack.i.l.bf16 %v2431_v13  ;;  %v2423_v16 = vunpack.i.h.bf16 %v2421_v14  ;;  %v2422_v17 = vunpack.i.l.bf16 %v2421_v14 }
 0x4ba   :  { %2243 = vmatprep.subr.msk.bf16.mxu1 %vm2913_vm3, %v2242_v9 }
 0x4bb   :  { %2246 = vmatpush1.bf16.msk.msra.mxu1 %vm2924_vm4, %v2245_v11  ;;  %v671_v21 = vsel %vm284_vm5, %v2423_v16, %v2433_v10  ;;  %v670_v22 = vsel %vm284_vm5, %v2422_v17, %v2432_v15  ;;  %v675_v44 = vsel %vm284_vm5, %v2433_v10, %v2423_v16  ;;  %v674_v28 = vsel %vm284_vm5, %v2432_v15, %v2422_v17  ;;  %v829_v11 = vld [vmem:[%s2713_s29] sm:$0xff]  ;;  %v832_v16 = vld [vmem:[%s2718_s3 + $0x8] sm:$0xff]  ;;  %s3453_s29 = sld [smem:[#allocation13_spill]] }
 0x4bc   :  { %v2436_v18 = vpop.permute.xlu0 %2435  ;;  %v2426_v20 = vpop.permute.xlu1 %2425  ;;  %794 = vmatprep.subr.bf16.mxu1 %v771_v27  ;;  %v2248_v47 = vpack.c.bf16 %v671_v21, %v670_v22  ;;  %v2251_v26 = vpack.c.bf16 %v675_v44, %v674_v28  ;;  %v831_v17 = vld [vmem:[%s2718_s3] sm:$0xff]  ;;  %s3454_s3 = sld [smem:[#allocation15_spill]] }
 0x4bd   :  { %v2438_v40 = vunpack.i.h.bf16 %v2436_v18  ;;  %v2437_v23 = vunpack.i.l.bf16 %v2436_v18  ;;  %v2428_v41 = vunpack.i.h.bf16 %v2426_v20  ;;  %v2427_v24 = vunpack.i.l.bf16 %v2426_v20  ;;  %v487_v22 = vpop.f32.mrf.mxu0 }
 0x4bf   :  { %795 = vmatpush1.bf16.msra.mxu1 %v770_v34  ;;  %v669_v29 = vsel %vm284_vm5, %v2428_v41, %v2438_v40  ;;  %v668_v30 = vsel %vm284_vm5, %v2427_v24, %v2437_v23  ;;  %v673_v33 = vsel %vm284_vm5, %v2438_v40, %v2428_v41  ;;  %v672_v27 = vsel %vm284_vm5, %v2437_v23, %v2427_v24  ;;  %v489_v40 = vpop.f32.mrf.mxu0 }
 0x4c0   :  { %796 = vmatprep.subr.bf16.mxu1 %v769_v43  ;;  %v2254_v34 = vpack.c.bf16 %v669_v29, %v668_v30  ;;  %v2257_v31 = vpack.c.bf16 %v673_v33, %v672_v27 }
 0x4c1   :  { %v491_v24 = vpop.f32.mrf.mxu0 }
 0x4c3   :  { %797 = vmatpush1.bf16.msra.mxu1 %v768_v46 }
 0x4c4   :  { %2249 = vmatprep.subr.msk.bf16.mxu1 %vm2962_vm7, %v2248_v47  ;;  %v493_v47 = vpop.f32.mrf.mxu0 }
 0x4c7   :  { %2252 = vmatpush1.bf16.msk.msra.mxu1 %vm2983_vm9, %v2251_v26 }
 0x4c8   :  { %2255 = vmatprep.subr.msk.bf16.mxu1 %vm2962_vm7, %v2254_v34 }
 0x4cb   :  { %2258 = vmatpush1.bf16.msk.msra.mxu1 %vm2983_vm9, %v2257_v31 }
 0x4ce   :  { %2187 = vmatmul.mubr.msk.bf16.vlgmr.msra.gmra.mxu1 %vm423_vm10, %v2541_v32 }
 0x4cf   :  { %1011 = vmatprep.mubr.bf16.mxu1 %v2669_v36 }
 0x58e   :  { %v820_v35 = vpop.f32.mrf.mxu1 }
 0x58f   :  { %v839_v53 = vmul.f32 %v820_v35, %v820_v35 }
 0x590   :  { %v822_v37 = vpop.f32.mrf.mxu1 }
 0x591   :  { %v833_v39 = vadd.f32 %v822_v37, %v820_v35  ;;  %v840_v50 = vmul.f32 %v822_v37, %v822_v37 }
 0x592   :  { %v824_v42 = vpop.f32.mrf.mxu1 }
 0x593   :  { %834 = vadd.xlane.f32.xlu1 %v833_v39  ;;  %v841_v48 = vmul.f32 %v824_v42, %v824_v42  ;;  %v843_v54 = vadd.f32 %v840_v50, %v839_v53 }
 0x594   :  { %v826_v43 = vpop.f32.mrf.mxu1 }
 0x595   :  { %v836_v46 = vadd.f32 %v826_v43, %v824_v42  ;;  %v842_v49 = vmul.f32 %v826_v43, %v826_v43 }
 0x597   :  { %837 = vadd.xlane.f32.xlu0 %v836_v46  ;;  %v846_v52 = vadd.f32 %v842_v49, %v841_v48 }
 0x599   :  { %847 = vadd.xlane.f32.xlu1 %v846_v52 }
 0x59b   :  { %844 = vadd.xlane.f32.xlu0 %v843_v54 }
 0x5aa   :  { %500 = vperm.xlu1 %2398, %v496_v56  }
 0x5b1   :  { %505 = vperm.xlu0 %2397, %v497_v57  }
 0x61c   :  { %v835_v58 = vpop.xlane.xlu1 %834 }
 0x61d   :  { %v849_v60 = vmul.f32 0.00390625, %v835_v58 }
 0x61f   :  { %v853_v3 = vmul.f32 %v849_v60, %v849_v60 }
 0x620   :  { %v838_v59 = vpop.xlane.xlu0 %837 }
 0x621   :  { %v850_v61 = vmul.f32 0.00390625, %v838_v59 }
 0x622   :  { %v848_v62 = vpop.xlane.xlu1 %847 }
 0x623   :  { %v854_v63 = vmul.f32 %v850_v61, %v850_v61  ;;  %v852_v1 = vmul.f32 0.00390625, %v848_v62 }
 0x624   :  { %v845_v2 = vpop.xlane.xlu0 %844 }
 0x625   :  { %v856_v4 = vsub.f32 %v852_v1, %v854_v63  ;;  %v851_v5 = vmul.f32 0.00390625, %v845_v2 }
 0x626   :  { %v501_v23 = vpop.permute.xlu1 %500 }
 0x627   :  { %v858_v6 = vadd.f32 1e-05, %v856_v4  ;;  %v855_v7 = vsub.f32 %v851_v5, %v853_v3  ;;  %v508_v27 = vadd.f32 %v501_v23, %v487_v22  ;;  %v509_v34 = vadd.f32 %v501_v23, %v489_v40 }
 0x629   :  { %2565 = vrsqrt.f32 %v858_v6  ;;  %v857_v8 = vadd.f32 1e-05, %v855_v7 }
 0x62b   :  { %2567 = vrsqrt.f32 %v857_v8 }
 0x62c   :  { %v506_v41 = vpop.permute.xlu0 %505 }
 0x62d   :  { %v510_v31 = vadd.f32 %v506_v41, %v491_v24  ;;  %v511_v32 = vadd.f32 %v506_v41, %v493_v47 }
 0x636   :  { %v2566_v9 = vpop.eup %2565 }
 0x637   :  { %v862_v13 = vmul.f32 %v2566_v9, %v830_v0 }
 0x638   :  { %v2568_v14 = vpop.eup %2567 }
 0x639   :  { %874 = vperm.xlu1 %2398, %v862_v13   ;;  %v861_v10 = vmul.f32 %v2568_v14, %v829_v11  ;;  %v864_v15 = vmul.f32 %v862_v13, %v850_v61 }
 0x63b   :  { %869 = vperm.xlu0 %2397, %v861_v10   ;;  %v863_v18 = vmul.f32 %v861_v10, %v849_v60  ;;  %v866_v20 = vsub.f32 %v832_v16, %v864_v15 }
 0x63d   :  { %v865_v21 = vsub.f32 %v831_v17, %v863_v18 }
 0x63f   :  { %888 = vperm.xlu0 %2397, %v866_v20   ;;  %883 = vperm.xlu1 %2398, %v865_v21   ;;  %v2543_v20 = vld [vmem:[%s2723_s8] sm:$0xff]  }
 0x6b4   :  { %v875_v44 = vpop.permute.xlu1 %874 }
 0x6b5   :  { %v879_v29 = vmul.f32 %v875_v44, %v824_v42  ;;  %v880_v30 = vmul.f32 %v875_v44, %v826_v43 }
 0x6b6   :  { %v870_v28 = vpop.permute.xlu0 %869 }
 0x6b7   :  { %v877_v26 = vmul.f32 %v870_v28, %v820_v35  ;;  %v878_v33 = vmul.f32 %v870_v28, %v822_v37 }
 0x6ba   :  { %v884_v39 = vpop.permute.xlu1 %883  ;;  %v889_v46 = vpop.permute.xlu0 %888 }
 0x6bb   :  { %v891_v48 = vadd.f32 %v884_v39, %v877_v26  ;;  %v892_v49 = vadd.f32 %v884_v39, %v878_v33  ;;  %v893_v50 = vadd.f32 %v889_v46, %v879_v29  ;;  %v894_v52 = vadd.f32 %v889_v46, %v880_v30 }
 0x6bd   :  { %v895_v53 = vadd.f32 %v891_v48, %v508_v27  ;;  %v896_v54 = vadd.f32 %v892_v49, %v509_v34  ;;  %v897_v56 = vadd.f32 %v893_v50, %v510_v31  ;;  %v898_v57 = vadd.f32 %v894_v52, %v511_v32 }
 0x6bf   :  { %v2439_v58 = vpack.i.bf16 %v897_v56, %v895_v53  ;;  %v2444_v59 = vpack.i.bf16 %v898_v57, %v896_v54  ;;  %v958_v42 = vpack.c.bf16 %v898_v57, %v896_v54  ;;  %v957_v43 = vpack.c.bf16 %v897_v56, %v895_v53  ;;  %v1039_v57 = vld [vmem:[%s2728_s14 + $0x8] sm:$0xff] }
 0x6c1   :  { %2440 = vrot.lane.b32.xlu1 %v2439_v58, %s2667_s0  ;;  %2445 = vrot.lane.b32.xlu0 %v2444_v59, %s2667_s0 }
 0x6c5   :  { %2450 = vrot.lane.b32.xlu1 %v2439_v58, %s2668_s5  ;;  %2455 = vrot.lane.b32.xlu0 %v2444_v59, %s2668_s5  ;;  %v1038_v59 = vld [vmem:[%s2728_s14] sm:$0xff]  ;;  %s3456_s14 = sld [smem:[#allocation17_spill]] }
 0x733   :  { %v2441_v35 = vpop.permute.xlu1 %2440  ;;  %v2446_v37 = vpop.permute.xlu0 %2445 }
 0x734   :  { %v2443_v60 = vunpack.i.h.bf16 %v2441_v35  ;;  %v2442_v61 = vunpack.i.l.bf16 %v2441_v35  ;;  %v2448_v62 = vunpack.i.h.bf16 %v2446_v37  ;;  %v2447_v63 = vunpack.i.l.bf16 %v2446_v37 }
 0x736   :  { %v924_v1 = vsel %vm321_vm1, %v2443_v60, %v2448_v62  ;;  %v926_v2 = vsel %vm321_vm1, %v2448_v62, %v2443_v60  ;;  %v923_v3 = vsel %vm321_vm1, %v2442_v61, %v2447_v63  ;;  %v925_v4 = vsel %vm321_vm1, %v2447_v63, %v2442_v61  ;;  %v1041_v60 = vld [vmem:[%s2733_s19 + $0x8] sm:$0xff]  ;;  %v1040_v61 = vld [vmem:[%s2733_s19] sm:$0xff]  ;;  %s3457_s19 = sld [smem:[#allocation18_spill]] }
 0x737   :  { %v2260_v5 = vpack.c.bf16 %v926_v2, %v925_v4  ;;  %v2263_v6 = vpack.c.bf16 %v924_v1, %v923_v3  ;;  %v2451_v7 = vpop.permute.xlu1 %2450  ;;  %v2456_v8 = vpop.permute.xlu0 %2455 }
 0x738   :  { %v2453_v0 = vunpack.i.h.bf16 %v2451_v7  ;;  %v2452_v9 = vunpack.i.l.bf16 %v2451_v7  ;;  %v2458_v11 = vunpack.i.h.bf16 %v2456_v8  ;;  %v2457_v13 = vunpack.i.l.bf16 %v2456_v8 }
 0x739   :  { %2261 = vmatprep.subr.msk.bf16.mxu1 %vm2913_vm3, %v2260_v5 }
 0x73a   :  { %v908_v14 = vsel %vm284_vm5, %v2453_v0, %v2458_v11  ;;  %v907_v10 = vsel %vm284_vm5, %v2452_v9, %v2457_v13  ;;  %2264 = vmatpush1.bf16.msk.msra.mxu1 %vm2924_vm4, %v2263_v6  ;;  %v910_v15 = vsel %vm284_vm5, %v2458_v11, %v2453_v0  ;;  %v909_v16 = vsel %vm284_vm5, %v2457_v13, %v2452_v9 }
 0x73b   :  { %991 = vmatprep.subr.bf16.mxu1 %v958_v42  ;;  %v2266_v17 = vpack.c.bf16 %v908_v14, %v907_v10  ;;  %v2269_v18 = vpack.c.bf16 %v910_v15, %v909_v16 }
 0x73e   :  { %992 = vmatpush1.bf16.msra.mxu1 %v957_v43 }
 0x73f   :  { %2267 = vmatprep.subr.msk.bf16.mxu1 %vm2962_vm7, %v2266_v17 }
 0x742   :  { %2270 = vmatpush1.bf16.msk.msra.mxu1 %vm2983_vm9, %v2269_v18 }
 0x745   :  { %2190 = vmatmul.mubr.msk.bf16.vlgmr.msra.gmra.mxu1 %vm972_vm11, %v2543_v20 }
 0x746   :  { %1021 = vmatprep.mubr.bf16.mxu1 %v2669_v36 }
 0x805   :  { %v1013_v21 = vpop.f32.mrf.mxu1 }
 0x806   :  { %v1048_v30 = vmul.f32 %v1013_v21, %v1013_v21 }
 0x807   :  { %v1015_v22 = vpop.f32.mrf.mxu1 }
 0x808   :  { %v1042_v40 = vadd.f32 %v1015_v22, %v1013_v21  ;;  %v1049_v47 = vmul.f32 %v1015_v22, %v1015_v22 }
 0x809   :  { %v1017_v23 = vpop.f32.mrf.mxu1 }
 0x80a   :  { %1043 = vadd.xlane.f32.xlu1 %v1042_v40  ;;  %v1050_v44 = vmul.f32 %v1017_v23, %v1017_v23  ;;  %v1052_v26 = vadd.f32 %v1049_v47, %v1048_v30 }
 0x80b   :  { %v1019_v41 = vpop.f32.mrf.mxu1 }
 0x80c   :  { %v1045_v24 = vadd.f32 %v1019_v41, %v1017_v23  ;;  %v1051_v28 = vmul.f32 %v1019_v41, %v1019_v41 }
 0x80e   :  { %1046 = vadd.xlane.f32.xlu0 %v1045_v24  ;;  %v1055_v29 = vadd.f32 %v1051_v28, %v1050_v44 }
 0x810   :  { %1056 = vadd.xlane.f32.xlu1 %v1055_v29 }
 0x812   :  { %1053 = vadd.xlane.f32.xlu0 %v1052_v26 }
 0x893   :  { %v1044_v33 = vpop.xlane.xlu1 %1043 }
 0x894   :  { %v1058_v34 = vmul.f32 0.00390625, %v1044_v33 }
 0x896   :  { %v1062_v49 = vmul.f32 %v1058_v34, %v1058_v34 }
 0x897   :  { %v1047_v27 = vpop.xlane.xlu0 %1046 }
 0x898   :  { %v1059_v31 = vmul.f32 0.00390625, %v1047_v27 }
 0x899   :  { %v1057_v32 = vpop.xlane.xlu1 %1056 }
 0x89a   :  { %v1063_v39 = vmul.f32 %v1059_v31, %v1059_v31  ;;  %v1061_v46 = vmul.f32 0.00390625, %v1057_v32 }
 0x89b   :  { %v1054_v48 = vpop.xlane.xlu0 %1053 }
 0x89c   :  { %v1065_v50 = vsub.f32 %v1061_v46, %v1063_v39  ;;  %v1060_v52 = vmul.f32 0.00390625, %v1054_v48 }
 0x89e   :  { %v1067_v53 = vadd.f32 1e-05, %v1065_v50  ;;  %v1064_v54 = vsub.f32 %v1060_v52, %v1062_v49 }
 0x8a0   :  { %2569 = vrsqrt.f32 %v1067_v53  ;;  %v1066_v56 = vadd.f32 1e-05, %v1064_v54 }
 0x8a2   :  { %2571 = vrsqrt.f32 %v1066_v56 }
 0x8ad   :  { %v2570_v58 = vpop.eup %2569 }
 0x8ae   :  { %v1071_v42 = vmul.f32 %v2570_v58, %v1039_v57  ;;  %v1170_v58 = vld [vmem:[%s2743_s30] sm:$0xf]  ;;  %s3459_s30 = sld [smem:[#allocation21_spill]] }
 0x8af   :  { %v2572_v43 = vpop.eup %2571 }
 0x8b0   :  { %1083 = vperm.xlu1 %2398, %v1071_v42   ;;  %v1070_v35 = vmul.f32 %v2572_v43, %v1038_v59  ;;  %v1073_v37 = vmul.f32 %v1071_v42, %v1059_v31 }
 0x8b2   :  { %1078 = vperm.xlu0 %2397, %v1070_v35   ;;  %v1072_v62 = vmul.f32 %v1070_v35, %v1058_v34  ;;  %v1075_v63 = vsub.f32 %v1041_v60, %v1073_v37 }
 0x8b4   :  { %v1074_v1 = vsub.f32 %v1040_v61, %v1072_v62  ;;  %v2550_v55 = vld [vmem:[%s3459_s30 + $0x8] sm:$0xff]  }
 0x8b6   :  { %1097 = vperm.xlu0 %2397, %v1075_v63   ;;  %1092 = vperm.xlu1 %2398, %v1074_v1   ;;  %v1030_v1 = vld [vmem:[%s2738_s24] sm:$0xff]  ;;  %s3458_s24 = sld [smem:[#allocation19_spill]] }
 0x92b   :  { %v1084_v2 = vpop.permute.xlu1 %1083 }
 0x92c   :  { %v1088_v4 = vmul.f32 %v1084_v2, %v1017_v23  ;;  %v1089_v5 = vmul.f32 %v1084_v2, %v1019_v41 }
 0x92d   :  { %v1079_v3 = vpop.permute.xlu0 %1078 }
 0x92e   :  { %v1086_v6 = vmul.f32 %v1079_v3, %v1013_v21  ;;  %v1087_v7 = vmul.f32 %v1079_v3, %v1015_v22  ;;  %v2544_v21 = vld [vmem:[%s2723_s8 + $0x8] ss:$0 sps:$4 sm:$0xff]   ;;  %s3455_s8 = sld [smem:[#allocation16_spill]] }
 0x92f   :  { %2191 = vmatmul.mubr.msk.bf16.gmra.mxu1 %vm972_vm11, %v2544_v21 }
 0x930   :  { %1342 = vmatprep.mubr.bf16.mxu1 %v2669_v36 }
 0x931   :  { %v1098_v8 = vpop.permute.xlu0 %1097  ;;  %v1093_v0 = vpop.permute.xlu1 %1092 }
 0x932   :  { %v1102_v9 = vadd.f32 %v1098_v8, %v1088_v4  ;;  %v1103_v11 = vadd.f32 %v1098_v8, %v1089_v5  ;;  %v1100_v13 = vadd.f32 %v1093_v0, %v1086_v6  ;;  %v1101_v14 = vadd.f32 %v1093_v0, %v1087_v7 }
 0x934   :  { %v1106_v10 = vmax.f32 %v1102_v9, 0.0  ;;  %v1107_v15 = vmax.f32 %v1103_v11, 0.0  ;;  %v1104_v16 = vmax.f32 %v1100_v13, 0.0  ;;  %v1105_v17 = vmax.f32 %v1101_v14, 0.0  ;;  %v1215_v13 = vld [vmem:[%s2748_s6] sm:$0xff]  ;;  %s3460_s6 = sld [smem:[#allocation20_spill]] }
 0x936   :  { %v1166_v18 = vpack.c.bf16 %v1106_v10, %v1104_v16  ;;  %v2464_v20 = vpack.i.bf16 %v1107_v15, %v1105_v17  ;;  %v2459_v40 = vpack.i.bf16 %v1106_v10, %v1104_v16  ;;  %v1167_v24 = vpack.c.bf16 %v1107_v15, %v1105_v17  ;;  %v1216_v15 = vld [vmem:[%s3444_s9] sm:$0xff] }
 0x938   :  { %2465 = vrot.lane.b32.xlu0 %v2464_v20, %s2667_s0  ;;  %2460 = vrot.lane.b32.xlu1 %v2459_v40, %s2667_s0 }
 0x93c   :  { %2475 = vrot.lane.b32.xlu0 %v2464_v20, %s2668_s5  ;;  %2470 = vrot.lane.b32.xlu1 %v2459_v40, %s2668_s5 }
 0x9aa   :  { %v2466_v22 = vpop.permute.xlu0 %2465  ;;  %v2461_v23 = vpop.permute.xlu1 %2460 }
 0x9ab   :  { %v2468_v41 = vunpack.i.h.bf16 %v2466_v22  ;;  %v2467_v44 = vunpack.i.l.bf16 %v2466_v22  ;;  %v2463_v28 = vunpack.i.h.bf16 %v2461_v23  ;;  %v2462_v47 = vunpack.i.l.bf16 %v2461_v23 }
 0x9ad   :  { %v1133_v29 = vsel %vm321_vm1, %v2463_v28, %v2468_v41  ;;  %v1135_v30 = vsel %vm321_vm1, %v2468_v41, %v2463_v28  ;;  %v1132_v26 = vsel %vm321_vm1, %v2462_v47, %v2467_v44  ;;  %v1134_v33 = vsel %vm321_vm1, %v2467_v44, %v2462_v47 }
 0x9ae   :  { %v2272_v27 = vpack.c.bf16 %v1135_v30, %v1134_v33  ;;  %v2275_v34 = vpack.c.bf16 %v1133_v29, %v1132_v26  ;;  %v2476_v31 = vpop.permute.xlu0 %2475  ;;  %v2471_v32 = vpop.permute.xlu1 %2470 }
 0x9af   :  { %v2478_v39 = vunpack.i.h.bf16 %v2476_v31  ;;  %v2477_v46 = vunpack.i.l.bf16 %v2476_v31  ;;  %v2473_v48 = vunpack.i.h.bf16 %v2471_v32  ;;  %v2472_v49 = vunpack.i.l.bf16 %v2471_v32 }
 0x9b0   :  { %2273 = vmatprep.subr.msk.bf16.mxu0 %vm2913_vm3, %v2272_v27 }
 0x9b1   :  { %v1117_v50 = vsel %vm284_vm5, %v2473_v48, %v2478_v39  ;;  %v1116_v52 = vsel %vm284_vm5, %v2472_v49, %v2477_v46  ;;  %2276 = vmatpush1.bf16.msk.msra.mxu0 %vm2924_vm4, %v2275_v34  ;;  %v1119_v53 = vsel %vm284_vm5, %v2478_v39, %v2473_v48  ;;  %v1118_v54 = vsel %vm284_vm5, %v2477_v46, %v2472_v49 }
 0x9b2   :  { %1186 = vmatprep.subr.bf16.mxu0 %v1167_v24  ;;  %v2278_v56 = vpack.c.bf16 %v1117_v50, %v1116_v52  ;;  %v2281_v57 = vpack.c.bf16 %v1119_v53, %v1118_v54 }
 0x9b5   :  { %1187 = vmatpush1.bf16.msra.mxu0 %v1166_v18 }
 0x9b6   :  { %2279 = vmatprep.subr.msk.bf16.mxu0 %vm2962_vm7, %v2278_v56 }
 0x9b9   :  { %2282 = vmatpush1.bf16.msk.msra.mxu0 %vm2983_vm9, %v2281_v57 }
 0x9bc   :  { %2192 = vmatmul.mubr.msk.bf16.vlgmr.msra.gmra.mxu0 %vm972_vm11, %v1170_v58 }
 0x9bd   :  { %1492 = vmatprep.mubr.bf16.mxu0 %v2669_v36 }
 0x9ef   :  { %v1023_v63 = vpop.f32.mrf.mxu1 }
 0x9f1   :  { %v1025_v2 = vpop.f32.mrf.mxu1 }
 0x9f3   :  { %v1027_v3 = vpop.f32.mrf.mxu1 }
 0x9f5   :  { %v1028_v4 = vpop.f32.mrf.mxu1 }
 0xa7c   :  { %v1208_v59 = vpop.f32.mrf.mxu0 }
 0xa7d   :  { %v1220_v35 = vmul.f32 %v1208_v59, %v1208_v59 }
 0xa7e   :  { %v1210_v42 = vpop.f32.mrf.mxu0 }
 0xa7f   :  { %v1217_v43 = vadd.f32 %v1210_v42, %v1208_v59  ;;  %v1221_v37 = vmul.f32 %v1210_v42, %v1210_v42 }
 0xa80   :  { %v1212_v60 = vpop.f32.mrf.mxu0 }
 0xa81   :  { %1218 = vadd.xlane.f32.xlu1 %v1217_v43  ;;  %v1222_v61 = vadd.f32 %v1221_v37, %v1220_v35 }
 0xa82   :  { %v1213_v62 = vpop.f32.mrf.mxu0 }
 0xa83   :  { %1223 = vadd.xlane.f32.xlu0 %v1222_v61 }
 0xa92   :  { %1033 = vperm.xlu1 %2398, %v1030_v1  }
 0xb0a   :  { %v1219_v5 = vpop.xlane.xlu1 %1218 }
 0xb0b   :  { %v1225_v6 = vmul.f32 0.00390625, %v1219_v5 }
 0xb0c   :  { %v1224_v7 = vpop.xlane.xlu0 %1223 }
 0xb0d   :  { %v1227_v8 = vmul.f32 %v1225_v6, %v1225_v6  ;;  %v1226_v0 = vmul.f32 0.00390625, %v1224_v7 }
 0xb0e   :  { %v1034_v18 = vpop.permute.xlu1 %1033 }
 0xb0f   :  { %v1228_v9 = vsub.f32 %v1226_v0, %v1227_v8  ;;  %v1036_v22 = vadd.f32 %v1034_v18, %v1023_v63  ;;  %v1037_v23 = vadd.f32 %v1034_v18, %v1025_v2  ;;  %v1378_v0 = vld [vmem:[%s3451_s21] sm:$0xff] }
 0xb11   :  { %v1229_v11 = vadd.f32 1e-05, %v1228_v9 }
 0xb13   :  { %2573 = vrsqrt.f32 %v1229_v11 }
 0xb20   :  { %v2574_v14 = vpop.eup %2573 }
 0xb21   :  { %v1231_v10 = vmul.f32 %v2574_v14, %v1215_v13 }
 0xb23   :  { %1236 = vperm.xlu0 %2397, %v1231_v10   ;;  %v1232_v16 = vmul.f32 %v1231_v10, %v1225_v6  ;;  %v1377_v6 = vld [vmem:[%s3450_s17] sm:$0xff] }
 0xb25   :  { %v1233_v17 = vsub.f32 %v1216_v15, %v1232_v16 }
 0xb27   :  { %1243 = vperm.xlu1 %2398, %v1233_v17  }
 0xb9e   :  { %v1237_v20 = vpop.permute.xlu0 %1236 }
 0xb9f   :  { %v1239_v40 = vmul.f32 %v1237_v20, %v1208_v59  ;;  %v1240_v24 = vmul.f32 %v1237_v20, %v1210_v42  ;;  %v2545_v59 = vld [vmem:[%s3445_s13] sm:$0xff]  }
 0xba2   :  { %v1244_v21 = vpop.permute.xlu1 %1243 }
 0xba3   :  { %v1246_v41 = vadd.f32 %v1244_v21, %v1239_v40  ;;  %v1247_v44 = vadd.f32 %v1244_v21, %v1240_v24  ;;  %v2547_v24 = vld [vmem:[%s3445_s13 + $0x8] ss:$0 sps:$4 sm:$0xff]  }
 0xba5   :  { %v1248_v28 = vadd.f32 %v1246_v41, %v1036_v22  ;;  %v1249_v47 = vadd.f32 %v1247_v44, %v1037_v23 }
 0xba7   :  { %1250 = vst [vmem:[#allocation5] sm:$0xff] %v1248_v28  ;;  %1252 = vst [vmem:[#allocation5 + $0x8] sm:$0xff] %v1249_v47  ;;  %v2484_v29 = vpack.i.bf16 %v1249_v47, %v1248_v28 }
 0xba9   :  { %2485 = vrot.lane.b32.xlu1 %v2484_v29, %s2668_s5  ;;  %2480 = vrot.lane.b32.xlu0 %v2484_v29, %s2667_s0 }
 0xc1b   :  { %v2486_v30 = vpop.permute.xlu1 %2485  ;;  %v2481_v26 = vpop.permute.xlu0 %2480 }
 0xc1c   :  { %v2488_v33 = vunpack.i.h.bf16 %v2486_v30  ;;  %v2487_v27 = vunpack.i.l.bf16 %v2486_v30  ;;  %v2483_v34 = vunpack.i.h.bf16 %v2481_v26  ;;  %v2482_v31 = vunpack.i.l.bf16 %v2481_v26 }
 0xc1e   :  { %v1265_v32 = vsel %vm321_vm1, %v2482_v31, %v2483_v34  ;;  %v1266_v39 = vsel %vm321_vm1, %v2483_v34, %v2482_v31  ;;  %v1257_v46 = vsel %vm284_vm5, %v2487_v27, %v2488_v33  ;;  %v1258_v54 = vsel %vm284_vm5, %v2488_v33, %v2487_v27 }
 0xc1f   :  { %v1268_v48 = vsel %vm2900_vm0, %v1266_v39, 0.0  ;;  %v1267_v49 = vsel %vm266_vm2, %v1265_v32, 0.0  ;;  %v2284_v56 = vpack.c.bf16 %v1249_v47, %v1257_v46  ;;  %v2287_v58 = vpack.c.bf16 %v1248_v28, %v1258_v54 }
 0xc20   :  { %v1284_v50 = vpack.c.bf16 %v1268_v48, %v1268_v48  ;;  %v1283_v52 = vpack.c.bf16 %v1267_v49, %v1267_v49 }
 0xc22   :  { %2195 = vmatprep.subr.msk.bf16.mxu1 %vm1303_vm12, %v1284_v50  ;;  %v1305_v57 = vsel %vm1303_vm12, %v1283_v52, 0 }
 0xc23   :  { %1323 = vmatpush1.bf16.msra.mxu1 %v1305_v57 }
 0xc24   :  { %2285 = vmatprep.subr.msk.bf16.mxu1 %vm3213_vm14, %v2284_v56 }
 0xc27   :  { %2288 = vmatpush1.bf16.msk.msra.mxu1 %vm3225_vm15, %v2287_v58 }
 0xc2a   :  { %2196 = vmatmul.mubr.msk.bf16.vlgmr.msra.gmra.mxu1 %vm1296_vm6, %v2545_v59 }
 0xc2b   :  { %1352 = vmatprep.mubr.bf16.mxu1 %v2669_v36 }
 0xc32   :  { %2197 = vmatmul.mubr.msk.bf16.gmra.mxu1 %vm1296_vm6, %v2547_v24 }
 0xc33   :  { %1944 = vmatprep.mubr.bf16.mxu1 %v2669_v36 }
 0xcea   :  { %v1344_v42 = vpop.f32.mrf.mxu1 }
 0xceb   :  { %v1382_v37 = vmul.f32 %v1344_v42, %v1344_v42 }
 0xcec   :  { %v1346_v43 = vpop.f32.mrf.mxu1 }
 0xced   :  { %v1379_v35 = vadd.f32 %v1346_v43, %v1344_v42  ;;  %v1383_v60 = vmul.f32 %v1346_v43, %v1346_v43 }
 0xcef   :  { %1380 = vadd.xlane.f32.xlu0 %v1379_v35  ;;  %v1384_v61 = vadd.f32 %v1383_v60, %v1382_v37  ;;  %v1361_v35 = vld [vmem:[%s3453_s29] sm:$0xff] }
 0xcf1   :  { %1385 = vadd.xlane.f32.xlu1 %v1384_v61  ;;  %v1362_v61 = vld [vmem:[%s3453_s29 + $0x8] sm:$0xff] }
 0xd78   :  { %v1381_v62 = vpop.xlane.xlu0 %1380 }
 0xd79   :  { %v1387_v63 = vmul.f32 0.00390625, %v1381_v62 }
 0xd7a   :  { %v1386_v1 = vpop.xlane.xlu1 %1385 }
 0xd7b   :  { %v1389_v2 = vmul.f32 %v1387_v63, %v1387_v63  ;;  %v1388_v3 = vmul.f32 0.00390625, %v1386_v1 }
 0xd7d   :  { %v1390_v4 = vsub.f32 %v1388_v3, %v1389_v2 }
 0xd7f   :  { %v1391_v5 = vadd.f32 1e-05, %v1390_v4 }
 0xd81   :  { %2575 = vrsqrt.f32 %v1391_v5 }
 0xd8e   :  { %v2576_v7 = vpop.eup %2575 }
 0xd8f   :  { %v1393_v8 = vmul.f32 %v2576_v7, %v1377_v6 }
 0xd91   :  { %1398 = vperm.xlu0 %2397, %v1393_v8   ;;  %v1394_v9 = vmul.f32 %v1393_v8, %v1387_v63 }
 0xd93   :  { %v1395_v11 = vsub.f32 %v1378_v0, %v1394_v9 }
 0xd95   :  { %1405 = vperm.xlu1 %2398, %v1395_v11  }
 0xe0c   :  { %v1399_v13 = vpop.permute.xlu0 %1398 }
 0xe0d   :  { %v1401_v14 = vmul.f32 %v1399_v13, %v1344_v42  ;;  %v1402_v10 = vmul.f32 %v1399_v13, %v1346_v43  ;;  %v1348_v43 = vpop.f32.mrf.mxu1 }
 0xe0f   :  { %v1350_v37 = vpop.f32.mrf.mxu1 }
 0xe10   :  { %v1406_v15 = vpop.permute.xlu1 %1405 }
 0xe11   :  { %v1408_v16 = vadd.f32 %v1406_v15, %v1401_v14  ;;  %v1409_v17 = vadd.f32 %v1406_v15, %v1402_v10  ;;  %v1354_v60 = vpop.f32.mrf.mxu1 }
 0xe13   :  { %v1410_v18 = vmax.f32 %v1408_v16, 0.0  ;;  %v1411_v20 = vmax.f32 %v1409_v17, 0.0  ;;  %v1356_v62 = vpop.f32.mrf.mxu1  ;;  %v1503_v16 = vld [vmem:[%s3454_s3] sm:$0xff] }
 0xe15   :  { %v2494_v40 = vpack.i.bf16 %v1411_v20, %v1410_v18  ;;  %v1358_v63 = vpop.f32.mrf.mxu1 }
 0xe17   :  { %2495 = vrot.lane.b32.xlu1 %v2494_v40, %s2668_s5  ;;  %2490 = vrot.lane.b32.xlu0 %v2494_v40, %s2667_s0  ;;  %v1359_v1 = vpop.f32.mrf.mxu1 }
 0xe89   :  { %v2496_v21 = vpop.permute.xlu1 %2495  ;;  %v2491_v22 = vpop.permute.xlu0 %2490 }
 0xe8a   :  { %v2498_v23 = vunpack.i.h.bf16 %v2496_v21  ;;  %v2497_v41 = vunpack.i.l.bf16 %v2496_v21  ;;  %v2493_v44 = vunpack.i.h.bf16 %v2491_v22  ;;  %v2492_v28 = vunpack.i.l.bf16 %v2491_v22  ;;  %v1505_v22 = vld [vmem:[%s3455_s8] sm:$0xff] }
 0xe8c   :  { %v1424_v47 = vsel %vm321_vm1, %v2492_v28, %v2493_v44  ;;  %v1425_v29 = vsel %vm321_vm1, %v2493_v44, %v2492_v28  ;;  %v1416_v30 = vsel %vm284_vm5, %v2497_v41, %v2498_v23  ;;  %v1417_v31 = vsel %vm284_vm5, %v2498_v23, %v2497_v41  ;;  %v1506_v23 = vld [vmem:[%s3455_s8 + $0x8] sm:$0xff] }
 0xe8d   :  { %v1427_v26 = vsel %vm2900_vm0, %v1425_v29, 0.0  ;;  %v1426_v33 = vsel %vm266_vm2, %v1424_v47, 0.0  ;;  %v2290_v32 = vpack.c.bf16 %v1411_v20, %v1416_v30  ;;  %v2293_v46 = vpack.c.bf16 %v1410_v18, %v1417_v31  ;;  %v1504_v20 = vld [vmem:[%s3454_s3 + $0x8] sm:$0xff] }
 0xe8e   :  { %v1443_v27 = vpack.c.bf16 %v1427_v26, %v1427_v26  ;;  %v1442_v34 = vpack.c.bf16 %v1426_v33, %v1426_v33 }
 0xe90   :  { %2199 = vmatprep.subr.msk.bf16.mxu0 %vm1303_vm12, %v1443_v27  ;;  %v1455_v39 = vsel %vm1303_vm12, %v1442_v34, 0 }
 0xe91   :  { %1473 = vmatpush1.bf16.msra.mxu0 %v1455_v39 }
 0xe92   :  { %2291 = vmatprep.subr.msk.bf16.mxu0 %vm3213_vm14, %v2290_v32 }
 0xe95   :  { %2294 = vmatpush1.bf16.msk.msra.mxu0 %vm3225_vm15, %v2293_v46 }
 0xe98   :  { %2200 = vmatmul.mubr.msk.bf16.vlgmr.msra.gmra.mxu0 %vm1296_vm6, %v2546_v45 }
 0xe99   :  { %1697 = vmatprep.mubr.bf16.mxu0 %v2669_v36 }
 0xf58   :  { %v1494_v48 = vpop.f32.mrf.mxu0 }
 0xf59   :  { %v1513_v56 = vmul.f32 %v1494_v48, %v1494_v48 }
 0xf5a   :  { %v1496_v49 = vpop.f32.mrf.mxu0 }
 0xf5b   :  { %v1507_v50 = vadd.f32 %v1496_v49, %v1494_v48  ;;  %v1514_v52 = vmul.f32 %v1496_v49, %v1496_v49 }
 0xf5c   :  { %v1498_v54 = vpop.f32.mrf.mxu0 }
 0xf5d   :  { %1508 = vadd.xlane.f32.xlu0 %v1507_v50  ;;  %v1517_v57 = vadd.f32 %v1514_v52, %v1513_v56  ;;  %v1515_v12 = vmul.f32 %v1498_v54, %v1498_v54 }
 0xf5e   :  { %v1500_v53 = vpop.f32.mrf.mxu0 }
 0xf5f   :  { %v1510_v58 = vadd.f32 %v1500_v53, %v1498_v54  ;;  %v1516_v59 = vmul.f32 %v1500_v53, %v1500_v53 }
 0xf61   :  { %1518 = vadd.xlane.f32.xlu0 %v1517_v57  ;;  %1511 = vadd.xlane.f32.xlu1 %v1510_v58  ;;  %v1520_v42 = vadd.f32 %v1516_v59, %v1515_v12 }
 0xf65   :  { %1521 = vadd.xlane.f32.xlu0 %v1520_v42 }
 0xf72   :  { %1365 = vperm.xlu1 %2398, %v1361_v35  }
 0xf76   :  { %1370 = vperm.xlu1 %2398, %v1362_v61  }
 0xfe6   :  { %v1509_v2 = vpop.xlane.xlu0 %1508 }
 0xfe7   :  { %v1523_v3 = vmul.f32 0.00390625, %v1509_v2 }
 0xfe9   :  { %v1527_v6 = vmul.f32 %v1523_v3, %v1523_v3 }
 0xfea   :  { %v1519_v4 = vpop.xlane.xlu0 %1518  ;;  %v1512_v5 = vpop.xlane.xlu1 %1511 }
 0xfeb   :  { %v1525_v7 = vmul.f32 0.00390625, %v1519_v4  ;;  %v1524_v8 = vmul.f32 0.00390625, %v1512_v5 }
 0xfed   :  { %v1529_v0 = vsub.f32 %v1525_v7, %v1527_v6  ;;  %v1528_v13 = vmul.f32 %v1524_v8, %v1524_v8 }
 0xfee   :  { %v1522_v9 = vpop.xlane.xlu0 %1521  ;;  %v1366_v47 = vpop.permute.xlu1 %1365 }
 0xfef   :  { %v1531_v11 = vadd.f32 1e-05, %v1529_v0  ;;  %v1526_v14 = vmul.f32 0.00390625, %v1522_v9  ;;  %v1373_v32 = vadd.f32 %v1366_v47, %v1348_v43  ;;  %v1374_v39 = vadd.f32 %v1366_v47, %v1350_v37 }
 0xff1   :  { %2577 = vrsqrt.f32 %v1531_v11  ;;  %v1530_v10 = vsub.f32 %v1526_v14, %v1528_v13 }
 0xff2   :  { %v1371_v29 = vpop.permute.xlu1 %1370 }
 0xff3   :  { %v1532_v15 = vadd.f32 1e-05, %v1530_v10  ;;  %v1375_v46 = vadd.f32 %v1371_v29, %v1354_v60  ;;  %v1376_v45 = vadd.f32 %v1371_v29, %v1356_v62 }
 0xff5   :  { %2579 = vrsqrt.f32 %v1532_v15 }
 0xffe   :  { %v2578_v17 = vpop.eup %2577 }
 0xfff   :  { %v1535_v18 = vmul.f32 %v2578_v17, %v1503_v16 }
0x1001   :  { %1543 = vperm.xlu1 %2398, %v1535_v18   ;;  %v1537_v21 = vmul.f32 %v1535_v18, %v1523_v3 }
0x1002   :  { %v2580_v40 = vpop.eup %2579 }
0x1003   :  { %v1536_v24 = vmul.f32 %v2580_v40, %v1504_v20  ;;  %v1539_v44 = vsub.f32 %v1505_v22, %v1537_v21  ;;  %v2548_v40 = vld [vmem:[%s3456_s14] sm:$0xff]  }
0x1005   :  { %1548 = vperm.xlu0 %2397, %v1536_v24   ;;  %v1538_v41 = vmul.f32 %v1536_v24, %v1524_v8 }
0x1007   :  { %v1540_v28 = vsub.f32 %v1506_v23, %v1538_v41 }
0x1009   :  { %1557 = vperm.xlu0 %2397, %v1539_v44   ;;  %1562 = vperm.xlu1 %2398, %v1540_v28  }
0x107c   :  { %v1544_v30 = vpop.permute.xlu1 %1543 }
0x107d   :  { %v1551_v33 = vmul.f32 %v1544_v30, %v1494_v48  ;;  %v1552_v27 = vmul.f32 %v1544_v30, %v1496_v49 }
0x1080   :  { %v1549_v26 = vpop.permute.xlu0 %1548 }
0x1081   :  { %v1553_v34 = vmul.f32 %v1549_v26, %v1498_v54  ;;  %v1554_v31 = vmul.f32 %v1549_v26, %v1500_v53 }
0x1084   :  { %v1558_v50 = vpop.permute.xlu0 %1557  ;;  %v1563_v52 = vpop.permute.xlu1 %1562 }
0x1085   :  { %v1565_v56 = vadd.f32 %v1558_v50, %v1551_v33  ;;  %v1566_v57 = vadd.f32 %v1558_v50, %v1552_v27  ;;  %v1567_v58 = vadd.f32 %v1563_v52, %v1553_v34  ;;  %v1568_v59 = vadd.f32 %v1563_v52, %v1554_v31 }
0x1087   :  { %v1569_v12 = vadd.f32 %v1565_v56, %v1373_v32  ;;  %v1570_v42 = vadd.f32 %v1566_v57, %v1374_v39  ;;  %v1571_v35 = vadd.f32 %v1567_v58, %v1375_v46  ;;  %v1572_v61 = vadd.f32 %v1568_v59, %v1376_v45 }
0x1089   :  { %v2499_v63 = vpack.i.bf16 %v1571_v35, %v1569_v12  ;;  %v2504_v1 = vpack.i.bf16 %v1572_v61, %v1570_v42  ;;  %v1632_v48 = vpack.c.bf16 %v1572_v61, %v1570_v42  ;;  %v1631_v49 = vpack.c.bf16 %v1571_v35, %v1569_v12  ;;  %v1760_v42 = vld [vmem:[%s3457_s19] sm:$0xff] }
0x108b   :  { %2500 = vrot.lane.b32.xlu0 %v2499_v63, %s2667_s0  ;;  %2505 = vrot.lane.b32.xlu1 %v2504_v1, %s2667_s0 }
0x108f   :  { %2510 = vrot.lane.b32.xlu0 %v2499_v63, %s2668_s5  ;;  %2515 = vrot.lane.b32.xlu1 %v2504_v1, %s2668_s5  ;;  %v1762_v63 = vld [vmem:[%s3458_s24] sm:$0xff]  ;;  %v1761_v1 = vld [vmem:[%s3457_s19 + $0x8] sm:$0xff] }
0x10fd   :  { %v2501_v54 = vpop.permute.xlu0 %2500  ;;  %v2506_v53 = vpop.permute.xlu1 %2505 }
0x10fe   :  { %v2503_v43 = vunpack.i.h.bf16 %v2501_v54  ;;  %v2502_v37 = vunpack.i.l.bf16 %v2501_v54  ;;  %v2508_v60 = vunpack.i.h.bf16 %v2506_v53  ;;  %v2507_v62 = vunpack.i.l.bf16 %v2506_v53 }
0x1100   :  { %v1598_v2 = vsel %vm321_vm1, %v2503_v43, %v2508_v60  ;;  %v1600_v3 = vsel %vm321_vm1, %v2508_v60, %v2503_v43  ;;  %v1597_v4 = vsel %vm321_vm1, %v2502_v37, %v2507_v62  ;;  %v1599_v5 = vsel %vm321_vm1, %v2507_v62, %v2502_v37  ;;  %v1763_v43 = vld [vmem:[%s3458_s24 + $0x8] sm:$0xff] }
0x1101   :  { %v2296_v6 = vpack.c.bf16 %v1600_v3, %v1599_v5  ;;  %v2299_v7 = vpack.c.bf16 %v1598_v2, %v1597_v4  ;;  %v2511_v8 = vpop.permute.xlu0 %2510  ;;  %v2516_v0 = vpop.permute.xlu1 %2515 }
0x1102   :  { %v2513_v9 = vunpack.i.h.bf16 %v2511_v8  ;;  %v2512_v11 = vunpack.i.l.bf16 %v2511_v8  ;;  %v2518_v13 = vunpack.i.h.bf16 %v2516_v0  ;;  %v2517_v14 = vunpack.i.l.bf16 %v2516_v0 }
0x1103   :  { %2297 = vmatprep.subr.msk.bf16.mxu0 %vm2913_vm3, %v2296_v6 }
0x1104   :  { %v1582_v10 = vsel %vm284_vm5, %v2513_v9, %v2518_v13  ;;  %v1581_v15 = vsel %vm284_vm5, %v2512_v11, %v2517_v14  ;;  %2300 = vmatpush1.bf16.msk.msra.mxu0 %vm2924_vm4, %v2299_v7  ;;  %v1584_v16 = vsel %vm284_vm5, %v2518_v13, %v2513_v9  ;;  %v1583_v17 = vsel %vm284_vm5, %v2517_v14, %v2512_v11 }
0x1105   :  { %1677 = vmatprep.subr.bf16.mxu0 %v1632_v48  ;;  %v2302_v18 = vpack.c.bf16 %v1582_v10, %v1581_v15  ;;  %v2305_v20 = vpack.c.bf16 %v1584_v16, %v1583_v17 }
0x1108   :  { %1678 = vmatpush1.bf16.msra.mxu0 %v1631_v49 }
0x1109   :  { %2303 = vmatprep.subr.msk.bf16.mxu0 %vm2962_vm7, %v2302_v18 }
0x110c   :  { %2306 = vmatpush1.bf16.msk.msra.mxu0 %vm2983_vm9, %v2305_v20 }
0x110f   :  { %2204 = vmatmul.mubr.msk.bf16.vlgmr.msra.gmra.mxu0 %vm972_vm11, %v2548_v40 }
0x1110   :  { %1707 = vmatprep.mubr.bf16.mxu0 %v2669_v36 }
0x11cf   :  { %v1699_v24 = vpop.f32.mrf.mxu0 }
0x11d0   :  { %v1770_v44 = vmul.f32 %v1699_v24, %v1699_v24 }
0x11d1   :  { %v1701_v21 = vpop.f32.mrf.mxu0 }
0x11d2   :  { %v1764_v22 = vadd.f32 %v1701_v21, %v1699_v24  ;;  %v1771_v23 = vmul.f32 %v1701_v21, %v1701_v21 }
0x11d3   :  { %v1703_v41 = vpop.f32.mrf.mxu0 }
0x11d4   :  { %1765 = vadd.xlane.f32.xlu0 %v1764_v22  ;;  %v1774_v30 = vadd.f32 %v1771_v23, %v1770_v44  ;;  %v1772_v26 = vmul.f32 %v1703_v41, %v1703_v41 }
0x11d5   :  { %v1705_v28 = vpop.f32.mrf.mxu0 }
0x11d6   :  { %v1767_v47 = vadd.f32 %v1705_v28, %v1703_v41  ;;  %v1773_v29 = vmul.f32 %v1705_v28, %v1705_v28 }
0x11d8   :  { %1775 = vadd.xlane.f32.xlu0 %v1774_v30  ;;  %1768 = vadd.xlane.f32.xlu1 %v1767_v47  ;;  %v1777_v33 = vadd.f32 %v1773_v29, %v1772_v26 }
0x11dc   :  { %1778 = vadd.xlane.f32.xlu0 %v1777_v33 }
0x125d   :  { %v1766_v27 = vpop.xlane.xlu0 %1765 }
0x125e   :  { %v1780_v34 = vmul.f32 0.00390625, %v1766_v27 }
0x1260   :  { %v1784_v39 = vmul.f32 %v1780_v34, %v1780_v34 }
0x1261   :  { %v1776_v31 = vpop.xlane.xlu0 %1775  ;;  %v1769_v32 = vpop.xlane.xlu1 %1768 }
0x1262   :  { %v1782_v46 = vmul.f32 0.00390625, %v1776_v31  ;;  %v1781_v45 = vmul.f32 0.00390625, %v1769_v32 }
0x1264   :  { %v1786_v50 = vsub.f32 %v1782_v46, %v1784_v39  ;;  %v1785_v57 = vmul.f32 %v1781_v45, %v1781_v45 }
0x1265   :  { %v1779_v52 = vpop.xlane.xlu0 %1778 }
0x1266   :  { %v1788_v56 = vadd.f32 1e-05, %v1786_v50  ;;  %v1783_v58 = vmul.f32 0.00390625, %v1779_v52 }
0x1268   :  { %2581 = vrsqrt.f32 %v1788_v56  ;;  %v1787_v59 = vsub.f32 %v1783_v58, %v1785_v57 }
0x126a   :  { %v1789_v12 = vadd.f32 1e-05, %v1787_v59 }
0x126c   :  { %2583 = vrsqrt.f32 %v1789_v12  ;;  %v2549_v12 = vld [vmem:[%s3459_s30] sm:$0xff]  }
0x1275   :  { %v2582_v35 = vpop.eup %2581 }
0x1276   :  { %v1792_v61 = vmul.f32 %v2582_v35, %v1760_v42 }
0x1278   :  { %1800 = vperm.xlu1 %2398, %v1792_v61   ;;  %v1794_v48 = vmul.f32 %v1792_v61, %v1780_v34 }
0x1279   :  { %v2584_v49 = vpop.eup %2583 }
0x127a   :  { %v1796_v54 = vsub.f32 %v1762_v63, %v1794_v48  ;;  %v1793_v53 = vmul.f32 %v2584_v49, %v1761_v1 }
0x127c   :  { %1814 = vperm.xlu1 %2398, %v1796_v54   ;;  %1805 = vperm.xlu0 %2397, %v1793_v53   ;;  %v1795_v37 = vmul.f32 %v1793_v53, %v1781_v45 }
0x127e   :  { %v1797_v60 = vsub.f32 %v1763_v43, %v1795_v37 }
0x1280   :  { %1819 = vperm.xlu1 %2398, %v1797_v60  }
0x12f3   :  { %v1801_v62 = vpop.permute.xlu1 %1800 }
0x12f4   :  { %v1808_v4 = vmul.f32 %v1801_v62, %v1699_v24  ;;  %v1809_v5 = vmul.f32 %v1801_v62, %v1701_v21  ;;  %v2551_v24 = vld [vmem:[%s3456_s14 + $0x8] sm:$0xff]   ;;  %v2552_v21 = vld [vmem:[%s3456_s14 + $0x10] sm:$0xff]  }
0x12f5   :  { %2205 = vmatmul.mubr.msk.bf16.gmra.mxu0 %vm972_vm11, %v2551_v24 }
0x12f6   :  { %1717 = vmatprep.mubr.bf16.mxu0 %v2669_v36 }
0x12f7   :  { %v1806_v2 = vpop.permute.xlu0 %1805  ;;  %v1815_v3 = vpop.permute.xlu1 %1814 }
0x12f8   :  { %v1810_v6 = vmul.f32 %v1806_v2, %v1703_v41  ;;  %v1811_v7 = vmul.f32 %v1806_v2, %v1705_v28  ;;  %v1822_v8 = vadd.f32 %v1815_v3, %v1808_v4  ;;  %v1823_v0 = vadd.f32 %v1815_v3, %v1809_v5 }
0x12fa   :  { %v1826_v14 = vmax.f32 %v1822_v8, 0.0  ;;  %v1827_v10 = vmax.f32 %v1823_v0, 0.0  ;;  %v1729_v0 = vld [vmem:[%s3460_s6 + $0x8] sm:$0xff] }
0x12fb   :  { %v1820_v9 = vpop.permute.xlu1 %1819 }
0x12fc   :  { %v1825_v11 = vadd.f32 %v1820_v9, %v1811_v7  ;;  %v1824_v13 = vadd.f32 %v1820_v9, %v1810_v6  ;;  %v1731_v9 = vld [vmem:[%s3460_s6 + $0x18] sm:$0xff] }
0x12fd   :  { %2206 = vmatmul.mubr.msk.bf16.gmra.mxu0 %vm972_vm11, %v2552_v21 }
0x12fe   :  { %v1829_v15 = vmax.f32 %v1825_v11, 0.0  ;;  %v1828_v16 = vmax.f32 %v1824_v13, 0.0  ;;  %v1728_v11 = vld [vmem:[%s3460_s6] sm:$0xff]  ;;  %v1730_v13 = vld [vmem:[%s3460_s6 + $0x10] sm:$0xff] }
0x1300   :  { %v2524_v17 = vpack.i.bf16 %v1829_v15, %v1827_v10  ;;  %v2519_v18 = vpack.i.bf16 %v1828_v16, %v1826_v14  ;;  %v1888_v20 = vpack.c.bf16 %v1828_v16, %v1826_v14  ;;  %v1889_v40 = vpack.c.bf16 %v1829_v15, %v1827_v10 }
0x1302   :  { %2525 = vrot.lane.b32.xlu1 %v2524_v17, %s2667_s0  ;;  %2520 = vrot.lane.b32.xlu0 %v2519_v18, %s2667_s0 }
0x1306   :  { %2535 = vrot.lane.b32.xlu1 %v2524_v17, %s2668_s5  ;;  %2530 = vrot.lane.b32.xlu0 %v2519_v18, %s2668_s5 }
0x1374   :  { %v2526_v22 = vpop.permute.xlu1 %2525  ;;  %v2521_v23 = vpop.permute.xlu0 %2520 }
0x1375   :  { %v2528_v41 = vunpack.i.h.bf16 %v2526_v22  ;;  %v2527_v44 = vunpack.i.l.bf16 %v2526_v22  ;;  %v2523_v28 = vunpack.i.h.bf16 %v2521_v23  ;;  %v2522_v47 = vunpack.i.l.bf16 %v2521_v23 }
0x1377   :  { %v1855_v29 = vsel %vm321_vm1, %v2523_v28, %v2528_v41  ;;  %v1857_v30 = vsel %vm321_vm1, %v2528_v41, %v2523_v28  ;;  %v1854_v26 = vsel %vm321_vm1, %v2522_v47, %v2527_v44  ;;  %v1856_v33 = vsel %vm321_vm1, %v2527_v44, %v2522_v47 }
0x1378   :  { %v2308_v27 = vpack.c.bf16 %v1857_v30, %v1856_v33  ;;  %v2311_v34 = vpack.c.bf16 %v1855_v29, %v1854_v26  ;;  %v2536_v31 = vpop.permute.xlu1 %2535  ;;  %v2531_v32 = vpop.permute.xlu0 %2530 }
0x1379   :  { %v2538_v39 = vunpack.i.h.bf16 %v2536_v31  ;;  %v2537_v46 = vunpack.i.l.bf16 %v2536_v31  ;;  %v2533_v45 = vunpack.i.h.bf16 %v2531_v32  ;;  %v2532_v50 = vunpack.i.l.bf16 %v2531_v32 }
0x137a   :  { %2309 = vmatprep.subr.msk.bf16.mxu1 %vm2913_vm3, %v2308_v27 }
0x137b   :  { %v1839_v52 = vsel %vm284_vm5, %v2533_v45, %v2538_v39  ;;  %v1838_v56 = vsel %vm284_vm5, %v2532_v50, %v2537_v46  ;;  %2312 = vmatpush1.bf16.msk.msra.mxu1 %vm2924_vm4, %v2311_v34  ;;  %v1841_v57 = vsel %vm284_vm5, %v2538_v39, %v2533_v45  ;;  %v1840_v58 = vsel %vm284_vm5, %v2537_v46, %v2532_v50  ;;  %v1965_v45 = vld [vmem:[%s2818_s20] sm:$0xff] }
0x137c   :  { %1924 = vmatprep.subr.bf16.mxu1 %v1889_v40  ;;  %v2314_v59 = vpack.c.bf16 %v1839_v52, %v1838_v56  ;;  %v2317_v51 = vpack.c.bf16 %v1841_v57, %v1840_v58  ;;  %v1966_v58 = vld [vmem:[%s2818_s20 + $0x8] sm:$0xff] }
0x137f   :  { %1925 = vmatpush1.bf16.msra.mxu1 %v1888_v20 }
0x1380   :  { %2315 = vmatprep.subr.msk.bf16.mxu1 %vm2962_vm7, %v2314_v59 }
0x1383   :  { %2318 = vmatpush1.bf16.msk.msra.mxu1 %vm2983_vm9, %v2317_v51 }
0x1386   :  { %2209 = vmatmul.mubr.msk.bf16.vlgmr.msra.gmra.mxu1 %vm972_vm11, %v2549_v12 }
0x1387   :  { %1954 = vmatprep.mubr.bf16.mxu1 %v2669_v36 }
0x138e   :  { %2210 = vmatmul.mubr.msk.bf16.gmra.mxu1 %vm972_vm11, %v2550_v55  ;;  %v1967_v55 = vld [vmem:[%s2818_s20 + $0x10] sm:$0xff] }
0x1446   :  { %v3341_v42 = vpop.f32.mrf.mxu1 }
0x1447   :  { %v1985_v19 = vmul.f32 %v3341_v42, %v3341_v42 }
0x1448   :  { %v3343_v38 = vpop.f32.mrf.mxu1 }
0x1449   :  { %v1973_v35 = vadd.f32 %v3343_v38, %v3341_v42  ;;  %v1986_v25 = vmul.f32 %v3343_v38, %v3343_v38 }
0x144a   :  { %v3351_v61 = vpop.f32.mrf.mxu1 }
0x144b   :  { %1974 = vadd.xlane.f32.xlu0 %v1973_v35  ;;  %v1993_v36 = vadd.f32 %v1986_v25, %v1985_v19  ;;  %v1987_v1 = vmul.f32 %v3351_v61, %v3351_v61  ;;  %v1969_v19 = vld [vmem:[%s2823_s27] sm:$0xff] }
0x144c   :  { %v3353_v63 = vpop.f32.mrf.mxu1 }
0x144d   :  { %v1988_v48 = vmul.f32 %v3353_v63, %v3353_v63  ;;  %1994 = vadd.xlane.f32.xlu1 %v1993_v36  ;;  %v1976_v54 = vadd.f32 %v3353_v63, %v3351_v61 }
0x144e   :  { %v3359_v49 = vpop.f32.mrf.mxu1 }
0x144f   :  { %v1989_v53 = vmul.f32 %v3359_v49, %v3359_v49  ;;  %v1996_v43 = vadd.f32 %v1988_v48, %v1987_v1  ;;  %v1970_v48 = vld [vmem:[%s2823_s27 + $0x8] sm:$0xff] }
0x1450   :  { %v3365_v37 = vpop.f32.mrf.mxu1 }
0x1451   :  { %v1990_v60 = vmul.f32 %v3365_v37, %v3365_v37  ;;  %1997 = vadd.xlane.f32.xlu0 %v1996_v43  ;;  %1977 = vadd.xlane.f32.xlu1 %v1976_v54  ;;  %v1979_v2 = vadd.f32 %v3365_v37, %v3359_v49  ;;  %v1971_v54 = vld [vmem:[%s2823_s27 + $0x10] sm:$0xff]  ;;  %v1968_v43 = vld [vmem:[%s2818_s20 + $0x18] sm:$0xff] }
0x1452   :  { %v3369_v62 = vpop.f32.mrf.mxu1 }
0x1453   :  { %v1999_v3 = vadd.f32 %v1990_v60, %v1989_v53  ;;  %v1991_v7 = vmul.f32 %v3369_v62, %v3369_v62 }
0x1454   :  { %v3373_v4 = vpop.f32.mrf.mxu1 }
0x1455   :  { %2000 = vadd.xlane.f32.xlu1 %v1999_v3  ;;  %1980 = vadd.xlane.f32.xlu0 %v1979_v2  ;;  %v1982_v5 = vadd.f32 %v3373_v4, %v3369_v62  ;;  %v1992_v6 = vmul.f32 %v3373_v4, %v3373_v4 }
0x1457   :  { %v2002_v8 = vadd.f32 %v1992_v6, %v1991_v7  ;;  %v1972_v7 = vld [vmem:[%s2823_s27 + $0x18] sm:$0xff] }
0x1459   :  { %1983 = vadd.xlane.f32.xlu0 %v1982_v5 }
0x145d   :  { %2003 = vadd.xlane.f32.xlu0 %v2002_v8 }
0x1466   :  { %1739 = vperm.xlu1 %2398, %v1729_v0  }
0x146a   :  { %1749 = vperm.xlu1 %2398, %v1731_v9  }
0x1473   :  { %1734 = vperm.xlu0 %2397, %v1728_v11  }
0x1477   :  { %1744 = vperm.xlu0 %2397, %v1730_v13  }
0x14d4   :  { %v1975_v14 = vpop.xlane.xlu0 %1974 }
0x14d5   :  { %v2005_v10 = vmul.f32 0.00390625, %v1975_v14 }
0x14d6   :  { %v1995_v15 = vpop.xlane.xlu1 %1994 }
0x14d7   :  { %v2013_v16 = vmul.f32 %v2005_v10, %v2005_v10  ;;  %v2009_v17 = vmul.f32 0.00390625, %v1995_v15 }
0x14d9   :  { %v2017_v18 = vsub.f32 %v2009_v17, %v2013_v16 }
0x14da   :  { %v1998_v20 = vpop.xlane.xlu0 %1997  ;;  %v1978_v40 = vpop.xlane.xlu1 %1977 }
0x14db   :  { %v2021_v24 = vadd.f32 1e-05, %v2017_v18  ;;  %v2006_v21 = vmul.f32 0.00390625, %v1978_v40  ;;  %v2010_v22 = vmul.f32 0.00390625, %v1998_v20 }
0x14dd   :  { %2585 = vrsqrt.f32 %v2021_v24  ;;  %v2014_v23 = vmul.f32 %v2006_v21, %v2006_v21 }
0x14de   :  { %v2001_v41 = vpop.xlane.xlu1 %2000  ;;  %v1981_v44 = vpop.xlane.xlu0 %1980 }
0x14df   :  { %v2018_v28 = vsub.f32 %v2010_v22, %v2014_v23  ;;  %v2007_v47 = vmul.f32 0.00390625, %v1981_v44  ;;  %v2011_v30 = vmul.f32 0.00390625, %v2001_v41 }
0x14e1   :  { %v2022_v29 = vadd.f32 1e-05, %v2018_v28  ;;  %v2015_v26 = vmul.f32 %v2007_v47, %v2007_v47 }
0x14e2   :  { %v1984_v33 = vpop.xlane.xlu0 %1983 }
0x14e3   :  { %2587 = vrsqrt.f32 %v2022_v29  ;;  %v2019_v27 = vsub.f32 %v2011_v30, %v2015_v26  ;;  %v2008_v34 = vmul.f32 0.00390625, %v1984_v33 }
0x14e5   :  { %v2023_v31 = vadd.f32 1e-05, %v2019_v27  ;;  %v2016_v39 = vmul.f32 %v2008_v34, %v2008_v34 }
0x14e6   :  { %v2004_v32 = vpop.xlane.xlu0 %2003 }
0x14e7   :  { %2589 = vrsqrt.f32 %v2023_v31  ;;  %v2012_v46 = vmul.f32 0.00390625, %v2004_v32 }
0x14e9   :  { %v2020_v50 = vsub.f32 %v2012_v46, %v2016_v39 }
0x14ea   :  { %v2586_v52 = vpop.eup %2585 }
0x14eb   :  { %v2024_v56 = vadd.f32 1e-05, %v2020_v50  ;;  %v2029_v57 = vmul.f32 %v2586_v52, %v1965_v45 }
0x14ed   :  { %2591 = vrsqrt.f32 %v2024_v56  ;;  %2043 = vperm.xlu1 %2398, %v2029_v57   ;;  %v2033_v12 = vmul.f32 %v2029_v57, %v2005_v10 }
0x14ef   :  { %v2037_v1 = vsub.f32 %v1969_v19, %v2033_v12 }
0x14f0   :  { %v2588_v59 = vpop.eup %2587 }
0x14f1   :  { %v2030_v51 = vmul.f32 %v2588_v59, %v1966_v58 }
0x14f3   :  { %2048 = vperm.xlu0 %2397, %v2030_v51   ;;  %v2034_v25 = vmul.f32 %v2030_v51, %v2006_v21 }
0x14f4   :  { %v2590_v35 = vpop.eup %2589 }
0x14f5   :  { %v2031_v36 = vmul.f32 %v2590_v35, %v1967_v55  ;;  %v2038_v60 = vsub.f32 %v1970_v48, %v2034_v25 }
0x14f7   :  { %v2035_v53 = vmul.f32 %v2031_v36, %v2007_v47  ;;  %2053 = vperm.xlu1 %2398, %v2031_v36   ;;  %2071 = vperm.xlu0 %2397, %v2037_v1  }
0x14f9   :  { %v2039_v2 = vsub.f32 %v1971_v54, %v2035_v53 }
0x14fa   :  { %v2592_v3 = vpop.eup %2591 }
0x14fb   :  { %2076 = vperm.xlu1 %2398, %v2038_v60   ;;  %2081 = vperm.xlu0 %2397, %v2039_v2   ;;  %v2032_v5 = vmul.f32 %v2592_v3, %v1968_v43 }
0x14fd   :  { %v2036_v6 = vmul.f32 %v2032_v5, %v2008_v34 }
0x14ff   :  { %2058 = vperm.xlu1 %2398, %v2032_v5   ;;  %v2040_v8 = vsub.f32 %v1972_v7, %v2036_v6 }
0x1503   :  { %2086 = vperm.xlu1 %2398, %v2040_v8  }
0x1504   :  { %2604 = shalt.err (!%p2601_p4)
}
0x1505   :  { %s2672_s20 = smov 128   ;;  %s2673_s22 = smov 8   ;;  %v1709_v0 = vpop.f32.mrf.mxu0  ;;  %v1740_v11 = vpop.permute.xlu1 %1739 }
0x1506   :  { %2137 = dma.vmem_to_hbm [thread:$0]  %s2132_s16, 256, %s2833_s12, [#allocation6], %s2672_s20, %s2672_s20, %s2673_s22   ;;  %v1735_v13 = vpop.permute.xlu0 %1734 }
0x1507   :  { %v1711_v9 = vpop.f32.mrf.mxu0  ;;  %v1752_v23 = vadd.f32 %v1735_v13, %v1709_v0  ;;  %s2674_s12 = smov [#allocation3]  }
0x1508   :  { %v1753_v41 = vadd.f32 %v1735_v13, %v1711_v9  ;;  %s2119_s27 = sshll.u32 %s2674_s12, 4  ;;  %s2120_s27 = int_to_ptr.vmem [resolvable:$true] %s2119_s27 }
0x1509   :  { %v1713_v14 = vpop.f32.mrf.mxu0  ;;  %v1750_v10 = vpop.permute.xlu1 %1749  ;;  %s2613_s23 = scalar_lea.vmem %s2120_s27, 1024  ;;  %p2618_p6 = scmp.lt.s32.totalorder %s2120_s27, %s2120_s27 }
0x150a   :  { %v1745_v15 = vpop.permute.xlu0 %1744  ;;  %p2614_p5 = scmp.ne.s32.totalorder %s2120_s27, %s2613_s23  ;;  %p2619_p7 = scmp.lt.s32.totalorder %s2613_s23, %s2613_s23 }
0x150b   :  { %v1715_v16 = vpop.f32.mrf.mxu0 }
0x150c   :  { %v1755_v31 = vadd.f32 %v1740_v11, %v1715_v16  ;;  %p2620_p8 = por %p2619_p7, %p2618_p6 }
0x150d   :  { %v1719_v20 = vpop.f32.mrf.mxu0 }
0x150e   :  { %p2621_p9 = pnand %p2620_p8, %p2614_p5 }
0x150f   :  { %v1721_v47 = vpop.f32.mrf.mxu0 }
0x1510   :  { %v1757_v32 = vadd.f32 %v1745_v15, %v1721_v47 }
0x1511   :  { %v1723_v56 = vpop.f32.mrf.mxu0 }
0x1512   :  { %v1758_v19 = vadd.f32 %v1750_v10, %v1723_v56 }
0x1513   :  { %v1725_v59 = vpop.f32.mrf.mxu0 }
0x1514   :  { %v1759_v35 = vadd.f32 %v1750_v10, %v1725_v59 }
0x1568   :  { %v2044_v17 = vpop.permute.xlu1 %2043 }
0x1569   :  { %v2061_v40 = vmul.f32 %v2044_v17, %v3341_v42  ;;  %v2062_v24 = vmul.f32 %v2044_v17, %v3343_v38  ;;  %v1754_v42 = vadd.f32 %v1740_v11, %v1713_v14  ;;  %v1756_v38 = vadd.f32 %v1745_v15, %v1719_v20 }
0x156e   :  { %v2049_v18 = vpop.permute.xlu0 %2048 }
0x156f   :  { %v2063_v29 = vmul.f32 %v2049_v18, %v3351_v61  ;;  %v2064_v30 = vmul.f32 %v2049_v18, %v3353_v63 }
0x1572   :  { %v2054_v21 = vpop.permute.xlu1 %2053  ;;  %v2072_v22 = vpop.permute.xlu0 %2071 }
0x1573   :  { %v2089_v44 = vadd.f32 %v2072_v22, %v2061_v40  ;;  %v2090_v28 = vadd.f32 %v2072_v22, %v2062_v24  ;;  %v2065_v26 = vmul.f32 %v2054_v21, %v3359_v49  ;;  %v2066_v33 = vmul.f32 %v2054_v21, %v3365_v37 }
0x1575   :  { %v2097_v27 = vadd.f32 %v2089_v44, %v1752_v23  ;;  %v2098_v34 = vadd.f32 %v2090_v28, %v1753_v41 }
0x1576   :  { %v2077_v39 = vpop.permute.xlu1 %2076  ;;  %v2082_v46 = vpop.permute.xlu0 %2081 }
0x1577   :  { %2105 = vst [vmem:[#allocation3] sm:$0xff] %v2097_v27  ;;  %2110 = vst [vmem:[#allocation3 + $0x20] sm:$0xff] %v2098_v34  ;;  %v2091_v45 = vadd.f32 %v2077_v39, %v2063_v29  ;;  %v2092_v50 = vadd.f32 %v2077_v39, %v2064_v30  ;;  %v2093_v52 = vadd.f32 %v2082_v46, %v2065_v26 }
0x1578   :  { %v2094_v61 = vadd.f32 %v2082_v46, %v2066_v33 }
0x1579   :  { %v2099_v63 = vadd.f32 %v2091_v45, %v1754_v42  ;;  %v2100_v57 = vadd.f32 %v2092_v50, %v1755_v31  ;;  %v2101_v49 = vadd.f32 %v2093_v52, %v1756_v38 }
0x157a   :  { %v2102_v58 = vadd.f32 %v2094_v61, %v1757_v32  ;;  %v2059_v37 = vpop.permute.xlu1 %2058 }
0x157b   :  { %2106 = vst [vmem:[#allocation3 + $0x8] sm:$0xff] %v2099_v63  ;;  %2111 = vst [vmem:[#allocation3 + $0x28] sm:$0xff] %v2100_v57  ;;  %v2067_v51 = vmul.f32 %v2059_v37, %v3369_v62  ;;  %v2068_v12 = vmul.f32 %v2059_v37, %v3373_v4 }
0x157c   :  { %2107 = vst [vmem:[#allocation3 + $0x10] sm:$0xff] %v2101_v49  ;;  %2112 = vst [vmem:[#allocation3 + $0x30] sm:$0xff] %v2102_v58 }
0x157e   :  { %v2087_v55 = vpop.permute.xlu1 %2086 }
0x157f   :  { %v2095_v25 = vadd.f32 %v2087_v55, %v2067_v51  ;;  %v2096_v36 = vadd.f32 %v2087_v55, %v2068_v12 }
0x1581   :  { %v2103_v1 = vadd.f32 %v2095_v25, %v1758_v19  ;;  %v2104_v48 = vadd.f32 %v2096_v36, %v1759_v35 }
0x1583   :  { %2108 = vst [vmem:[#allocation3 + $0x18] sm:$0xff] %v2103_v1  ;;  %2113 = vst [vmem:[#allocation3 + $0x38] sm:$0xff] %v2104_v48 }
0x1584   :  { %2624 = shalt.err (!%p2621_p9)
}
0x1585   :  { %2125 = dma.vmem_to_hbm [thread:$0]  %s2120_s27, 1024, %s2828_s4, [#allocation4], %s2672_s20, %s2672_s20, %s2673_s22  }
0x1586   :  { %2633 = dma.done.wait [#allocation4], 1024  }
0x1587   :  { %2634 = vsyncadd [#allocation4], 4294966272 }
0x1588   :  { %2635 = dma.done.wait [#allocation6], 256  }
0x1589   :  { %2636 = vsyncadd [#allocation6], 4294967040 }
0x158a   :  { %2144 = vsyncpa [#allocation4], 1 }
0x158b   :  { %2145 = vsyncpa [#allocation6], 1 }

</bundles_post_ra>
